<compile_context>
chip_gen: v6e
topology: v6e:2x2x1
jax: 0.10.0
libtpu: 0.0.40
codegen_flags: <defaults>
</compile_context>

<pallas_src>
import functools
import math

import jax
import jax.numpy as jnp
from jax.experimental import pallas as pl
from jax.experimental.pallas import tpu as pltpu


def _round_up(x, m):
    return ((x + m - 1) // m) * m


def _pad_axis(x, mult, axis):
    pad = (-x.shape[axis]) % mult
    if pad == 0:
        return x
    widths = [(0, 0)] * x.ndim
    widths[axis] = (0, pad)
    return jnp.pad(x, widths)


def _sage_kernel(adj_ref, h_ref, hself_ref, deg_inv_ref, w_self_ref, b_self_ref,
                 w_neigh_ref, b_neigh_ref, gamma_ref, beta_ref,
                 out_ref, acc_ref, self_ref, *, use_relu, eps, tk, h_resident):
    k = pl.program_id(1)

    # ---- k == 0: zero the spmm accumulator and hoist the k-independent
    #      self-path matmul (+ReLU) out of the epilogue --------------------------
    @pl.when(k == 0)
    def _():
        acc_ref[...] = jnp.zeros_like(acc_ref)
        sh = jnp.dot(hself_ref[...], w_self_ref[...],
                     preferred_element_type=jnp.float32) + b_self_ref[...]
        if use_relu:
            sh = jnp.maximum(sh, 0.0)
        self_ref[...] = sh

    # ---- spmm reduction: acc += mask_tile @ h_tile ------------------------------
    # int8 {0,1} mask -> bf16 cast is a cheap VPU op; accumulation stays f32.
    if h_resident:
        start = pl.multiple_of(k * tk, tk)
        h_blk = h_ref[pl.ds(start, tk), :]
    else:
        h_blk = h_ref[...]
    acc_ref[...] += jnp.dot(adj_ref[...].astype(h_blk.dtype), h_blk,
                            preferred_element_type=jnp.float32)

    # ---- epilogue on the last k step: degree scale, neigh linear, relu,
    #      virtual-concat LayerNorm ----------------------------------------------
    @pl.when(k == pl.num_programs(1) - 1)
    def _():
        dout = w_self_ref.shape[1]
        inv_width = 1.0 / (2 * dout)

        # mean aggregation: support = (1/deg) * (mask @ h), degree scale in f32.
        support = (acc_ref[...] * deg_inv_ref[...]).astype(w_neigh_ref.dtype)
        neigh_h = jnp.dot(support, w_neigh_ref[...],
                          preferred_element_type=jnp.float32) + b_neigh_ref[...]
        if use_relu:  # activation = F.relu (elementwise, so per-half == concat)
            neigh_h = jnp.maximum(neigh_h, 0.0)
        self_h = self_ref[...]

        # LayerNorm over the *virtual* concat [self_h | neigh_h] (width 2*Dout)
        # without materializing it: combine per-half statistics.
        mean = (jnp.sum(self_h, axis=1, keepdims=True)
                + jnp.sum(neigh_h, axis=1, keepdims=True)) * inv_width
        d_self = self_h - mean
        d_neigh = neigh_h - mean
        var = (jnp.sum(d_self * d_self, axis=1, keepdims=True)
               + jnp.sum(d_neigh * d_neigh, axis=1, keepdims=True)) * inv_width
        rstd = jax.lax.rsqrt(var + eps)

        # store each normalized half at its static lane offset (no concat copy)
        out_ref[:, 0:dout] = ((d_self * rstd) * gamma_ref[:, 0:dout]
                              + beta_ref[:, 0:dout]).astype(out_ref.dtype)
        out_ref[:, dout:2 * dout] = ((d_neigh * rstd) * gamma_ref[:, dout:2 * dout]
                                     + beta_ref[:, dout:2 * dout]).astype(out_ref.dtype)


def sage_conv(adj_mask, deg_inv, h, params, *, use_relu=True, eps=1e-5,
              tm=512, tk=2048, out_dtype=jnp.float32):
    """Fused SAGEConv forward.

    adj_mask: (out_nodes, num_nodes) int8 {0,1} sampled-neighbor mask.
    deg_inv:  (out_nodes, 1) f32 per-row 1/degree (mean aggregation); together
              these represent the module's row-normalized `adj` exactly, so the
              dominant HBM stream stays 1 B/elem and 1/deg is applied in f32.
    h:        (num_nodes, Din) f32 node features.
    Returns (out_nodes, 2 * Dout) in `out_dtype` (f32 default; pass bf16 to
    halve writeback if downstream accepts it).

    tm tiles out_nodes, tk tiles the spmm reduction (num_nodes).  Large tiles
    amortize per-step overhead on every generation; tm is clamped so at least
    two i-tiles exist (megacore sharding on v7x).  h is kept fully VMEM
    resident when it fits the per-chip budget (v5e/v6e 128 MiB, v7x 64 MiB).
    """
    M, N = adj_mask.shape
    Nh, Din = h.shape
    assert Nh == N, "adjacency / feature shape mismatch"
    assert M <= N, "out_nodes must be <= num_nodes (self features = h[:out_nodes])"
    Dout = params["w_self"].shape[1]

    # ---- tile selection ---------------------------------------------------------
    tm = max(128, min(_round_up(tm, 128), _round_up(M, 128)))
    Mp = _round_up(M, tm)
    if Mp // tm < 2 and Mp >= 256:           # keep >= 2 i-tiles for megacore
        tm = max(128, (Mp // 2) // 128 * 128)
        Mp = _round_up(M, tm)
    tk = max(256, min(_round_up(tk, 256), _round_up(N, 256)))
    Np = _round_up(N, tk)
    grid = (Mp // tm, Np // tk)

    # ---- operand preparation (no astype round trip on the big int8 mask; pads
    #      are no-ops for aligned shapes and exact — zero-padding a 0/1 mask) ----
    adj_p = _pad_axis(_pad_axis(adj_mask.astype(jnp.int8), tm, 0), tk, 1)
    h_b16 = h.astype(jnp.bfloat16)
    h_p = _pad_axis(h_b16, tk, 0)
    hself_p = _pad_axis(h_b16[:M], tm, 0)
    deg_p = _pad_axis(deg_inv.reshape(M, 1).astype(jnp.float32), tm, 0)
    w_self = params["w_self"].astype(jnp.bfloat16)
    w_neigh = params["w_neigh"].astype(jnp.bfloat16)

    # ---- VMEM budget: full-h residency when it fits ------------------------------
    try:
        vmem_cap = int(pltpu.get_tpu_info().vmem_capacity_bytes)
    except Exception:
        vmem_cap = 64 * 1024 * 1024          # conservative (v7x per-TensorCore)
    working = (2 * tm * tk * 1               # adj double-buffer (int8)
               + 2 * tm * Din * 2            # hself double-buffer (bf16)
               + 2 * tm * 4                  # deg_inv
               + 2 * tm * 2 * Dout * 4       # output double-buffer (f32 worst case)
               + tm * Din * 4 + tm * Dout * 4            # scratch accumulators
               + 2 * (2 * Din * Dout * 2 + 6 * Dout * 4))  # resident params
    h_resident = (2 * Np * Din * 2 + working) <= int(0.75 * vmem_cap)
    h_rows = Np if h_resident else tk
    vmem_limit = min(int(0.9 * vmem_cap),
                     max(32 * 1024 * 1024,
                         2 * h_rows * Din * 2 + working + 4 * 1024 * 1024))

    if h_resident:
        h_spec = pl.BlockSpec((Np, Din), lambda i, k: (0, 0))     # VMEM-resident
    else:
        h_spec = pl.BlockSpec((tk, Din), lambda i, k: (k, 0))     # streamed

    kernel = functools.partial(_sage_kernel, use_relu=use_relu, eps=eps,
                               tk=tk, h_resident=h_resident)

    out_p = pl.pallas_call(
        kernel,
        out_shape=jax.ShapeDtypeStruct((Mp, 2 * Dout), out_dtype),
        grid_spec=pltpu.PrefetchScalarGridSpec(
            num_scalar_prefetch=0,
            grid=grid,
            in_specs=[
                pl.BlockSpec((tm, tk), lambda i, k: (i, k)),        # adj mask tile (int8)
                h_spec,                                             # h (resident or streamed)
                pl.BlockSpec((tm, Din), lambda i, k: (i, 0)),       # h[:M] tile (self path)
                pl.BlockSpec((tm, 1), lambda i, k: (i, 0)),         # 1/deg per row (f32)
                pl.BlockSpec((Din, Dout), lambda i, k: (0, 0)),     # W_self   (resident)
                pl.BlockSpec((1, Dout), lambda i, k: (0, 0)),       # b_self   (resident)
                pl.BlockSpec((Din, Dout), lambda i, k: (0, 0)),     # W_neigh  (resident)
                pl.BlockSpec((1, Dout), lambda i, k: (0, 0)),       # b_neigh  (resident)
                pl.BlockSpec((1, 2 * Dout), lambda i, k: (0, 0)),   # gamma    (resident)
                pl.BlockSpec((1, 2 * Dout), lambda i, k: (0, 0)),   # beta     (resident)
            ],
            out_specs=pl.BlockSpec((tm, 2 * Dout), lambda i, k: (i, 0)),
            scratch_shapes=[pltpu.VMEM((tm, Din), jnp.float32),     # support accumulator
                            pltpu.VMEM((tm, Dout), jnp.float32)],   # hoisted self_h
        ),
        compiler_params=pltpu.CompilerParams(
            dimension_semantics=("parallel", "arbitrary"),
            vmem_limit_bytes=int(vmem_limit),
        ),
    )(adj_p, h_p, hself_p, deg_p, w_self, params["b_self"],
      w_neigh, params["b_neigh"], params["gamma"], params["beta"])

    return out_p[:M]


def init_params(key, input_dim, output_dim):
    """nn.Linear default init: U(-1/sqrt(in), 1/sqrt(in)); LayerNorm: ones/zeros."""
    k1, k2, k3, k4 = jax.random.split(key, 4)
    bound = 1.0 / math.sqrt(input_dim)
    return {
        # weights stored transposed (in, out) so the kernel does x @ W
        "w_self": jax.random.uniform(k1, (input_dim, output_dim), jnp.float32,
                                     -bound, bound),
        "b_self": jax.random.uniform(k2, (1, output_dim), jnp.float32,
                                     -bound, bound),
        "w_neigh": jax.random.uniform(k3, (input_dim, output_dim), jnp.float32,
                                      -bound, bound),
        "b_neigh": jax.random.uniform(k4, (1, output_dim), jnp.float32,
                                      -bound, bound),
        "gamma": jnp.ones((1, 2 * output_dim), jnp.float32),
        "beta": jnp.zeros((1, 2 * output_dim), jnp.float32),
    }


def sage_conv_ref(adj_mask, deg_inv, h, params, *, use_relu=True, eps=1e-5):
    """Pure-JAX reference mirroring the PyTorch forward with the same precision
    recipe (bf16 MXU inputs, f32 accumulation, f32 1/deg scale)."""
    M = adj_mask.shape[0]
    h_b = h.astype(jnp.bfloat16)
    support = jnp.dot(adj_mask.astype(jnp.bfloat16), h_b,
                      preferred_element_type=jnp.float32) * deg_inv.reshape(M, 1)
    self_h = jnp.dot(h_b[:M], params["w_self"].astype(jnp.bfloat16),
                     preferred_element_type=jnp.float32) + params["b_self"]
    neigh_h = jnp.dot(support.astype(jnp.bfloat16),
                      params["w_neigh"].astype(jnp.bfloat16),
                      preferred_element_type=jnp.float32) + params["b_neigh"]
    z = jnp.concatenate([self_h, neigh_h], axis=1)
    if use_relu:
        z = jnp.maximum(z, 0.0)
    mean = jnp.mean(z, axis=1, keepdims=True)
    var = jnp.mean((z - mean) ** 2, axis=1, keepdims=True)
    return (z - mean) * jax.lax.rsqrt(var + eps) * params["gamma"] + params["beta"]


if __name__ == "__main__":
    key = jax.random.PRNGKey(0)
    k_adj, k_h, k_p = jax.random.split(key, 3)

    # lane-dense dims (multiples of 128) keep the MXU full and stores unmasked
    out_nodes, num_nodes = 256, 512
    input_dim, output_dim = 128, 128

    # sampled-neighbor mask (int8 {0,1}) + per-row 1/deg (mean aggregation);
    # together they represent the module's row-normalized dense adjacency.
    mask = jax.random.uniform(k_adj, (out_nodes, num_nodes)) < 0.1
    mask = mask.at[:, 0].set(True)                     # ensure no empty rows
    adj_mask = mask.astype(jnp.int8)
    deg_inv = 1.0 / jnp.sum(mask.astype(jnp.float32), axis=1, keepdims=True)

    h = jax.random.normal(k_h, (num_nodes, input_dim), jnp.float32)
    params = init_params(k_p, input_dim, output_dim)

    out = sage_conv(adj_mask, deg_inv, h, params, use_relu=True)
    out = jax.block_until_ready(out)

    ref = sage_conv_ref(adj_mask, deg_inv, h, params, use_relu=True)
    assert out.shape == (out_nodes, 2 * output_dim)
    max_err = float(jnp.max(jnp.abs(out - ref)))
    assert jnp.allclose(out, ref, atol=1e-2, rtol=1e-2), \
        f"mismatch vs reference, max abs err {max_err}"

    print("KERNEL_OK")
</pallas_src>

<mosaic_0001>
module attributes {stable_mosaic.version = 11 : i64} {
  func.func @_sage_kernel(%arg0: i32, %arg1: i32, %arg2: memref<128x512xi8, #tpu.memory_space<vmem>>, %arg3: memref<512x128xbf16, #tpu.memory_space<vmem>>, %arg4: memref<128x128xbf16, #tpu.memory_space<vmem>>, %arg5: memref<128x1xf32, #tpu.memory_space<vmem>>, %arg6: memref<128x128xbf16, #tpu.memory_space<vmem>>, %arg7: memref<1x128xf32, #tpu.memory_space<vmem>>, %arg8: memref<128x128xbf16, #tpu.memory_space<vmem>>, %arg9: memref<1x128xf32, #tpu.memory_space<vmem>>, %arg10: memref<1x256xf32, #tpu.memory_space<vmem>>, %arg11: memref<1x256xf32, #tpu.memory_space<vmem>>, %arg12: memref<128x256xf32, #tpu.memory_space<vmem>>, %arg13: memref<128x128xf32, #tpu.memory_space<vmem>>, %arg14: memref<128x128xf32, #tpu.memory_space<vmem>>) attributes {dimension_semantics = [#tpu.dimension_semantics<parallel>, #tpu.dimension_semantics<arbitrary>], iteration_bounds = array<i64: 2, 1>, scalar_prefetch = 0 : i64, scratch_operands = 2 : i64, tpu.core_type = #tpu.core_type<tc>, window_params = [{transform_indices = @transform_0, window_bounds = array<i64: 128, 512>}, {pipeline_mode = #tpu.pipeline_mode<synchronous>, transform_indices = @transform_1, window_bounds = array<i64: 512, 128>}, {transform_indices = @transform_2, window_bounds = array<i64: 128, 128>}, {transform_indices = @transform_3, window_bounds = array<i64: 128, 1>}, {pipeline_mode = #tpu.pipeline_mode<synchronous>, transform_indices = @transform_4, window_bounds = array<i64: 128, 128>}, {pipeline_mode = #tpu.pipeline_mode<synchronous>, transform_indices = @transform_5, window_bounds = array<i64: 1, 128>}, {pipeline_mode = #tpu.pipeline_mode<synchronous>, transform_indices = @transform_6, window_bounds = array<i64: 128, 128>}, {pipeline_mode = #tpu.pipeline_mode<synchronous>, transform_indices = @transform_7, window_bounds = array<i64: 1, 128>}, {pipeline_mode = #tpu.pipeline_mode<synchronous>, transform_indices = @transform_8, window_bounds = array<i64: 1, 256>}, {pipeline_mode = #tpu.pipeline_mode<synchronous>, transform_indices = @transform_9, window_bounds = array<i64: 1, 256>}, {transform_indices = @transform_10, window_bounds = array<i64: 128, 256>}]} {
    %c0_i32 = arith.constant 0 : i32
    %0 = arith.cmpi eq, %arg1, %c0_i32 : i32
    %1 = arith.extui %0 : i1 to i32
    %c0_i32_0 = arith.constant 0 : i32
    %2 = arith.cmpi ne, %1, %c0_i32_0 : i32
    scf.if %2 {
      %cst_9 = arith.constant 0.000000e+00 : f32
      %16 = vector.broadcast %cst_9 : f32 to vector<128x128xf32>
      %c0_10 = arith.constant 0 : index
      %c0_11 = arith.constant 0 : index
      %17 = vector.load %arg13[%c0_10, %c0_11] : memref<128x128xf32, #tpu.memory_space<vmem>>, vector<128x128xf32>
      tpu.vector_store %arg13[%c0_10, %c0_11], %16 {strides = array<i32>} : memref<128x128xf32, #tpu.memory_space<vmem>>, vector<128x128xf32>,
      %c0_12 = arith.constant 0 : index
      %c0_13 = arith.constant 0 : index
      %18 = vector.load %arg4[%c0_12, %c0_13] : memref<128x128xbf16, #tpu.memory_space<vmem>>, vector<128x128xbf16>
      %c0_14 = arith.constant 0 : index
      %c0_15 = arith.constant 0 : index
      %19 = vector.load %arg6[%c0_14, %c0_15] : memref<128x128xbf16, #tpu.memory_space<vmem>>, vector<128x128xbf16>
      %cst_16 = arith.constant dense<0.000000e+00> : vector<128x128xf32>
      %20 = tpu.matmul %18, %19, %cst_16 {dimension_numbers = #tpu.dot_dimension_numbers<[1], [0], [0], [1], [0, 0, 1, 1], [], []>} : vector<128x128xbf16>, vector<128x128xbf16>, vector<128x128xf32> -> vector<128x128xf32>
      %c0_17 = arith.constant 0 : index
      %c0_18 = arith.constant 0 : index
      %21 = vector.load %arg7[%c0_17, %c0_18] : memref<1x128xf32, #tpu.memory_space<vmem>>, vector<1x128xf32>
      %22 = vector.broadcast %21 : vector<1x128xf32> to vector<128x128xf32>
      %23 = arith.addf %20, %22 : vector<128x128xf32>
      %cst_19 = arith.constant 0.000000e+00 : f32
      %24 = vector.broadcast %cst_19 : f32 to vector<128x128xf32>
      %25 = arith.maximumf %23, %24 : vector<128x128xf32>
      %c0_20 = arith.constant 0 : index
      %c0_21 = arith.constant 0 : index
      %26 = vector.load %arg14[%c0_20, %c0_21] : memref<128x128xf32, #tpu.memory_space<vmem>>, vector<128x128xf32>
      tpu.vector_store %arg14[%c0_20, %c0_21], %25 {strides = array<i32>} : memref<128x128xf32, #tpu.memory_space<vmem>>, vector<128x128xf32>,
    } else {
    }
    %c512_i32 = arith.constant 512 : i32
    %3 = arith.muli %arg1, %c512_i32 : i32
    %4 = tpu.assume_multiple %3, 512 : i32
    %5 = arith.index_cast %4 : i32 to index
    %c0 = arith.constant 0 : index
    %6 = vector.load %arg3[%5, %c0] : memref<512x128xbf16, #tpu.memory_space<vmem>>, vector<512x128xbf16>
    %c0_1 = arith.constant 0 : index
    %c0_2 = arith.constant 0 : index
    %7 = vector.load %arg13[%c0_1, %c0_2] : memref<128x128xf32, #tpu.memory_space<vmem>>, vector<128x128xf32>
    %c0_3 = arith.constant 0 : index
    %c0_4 = arith.constant 0 : index
    %8 = vector.load %arg2[%c0_3, %c0_4] : memref<128x512xi8, #tpu.memory_space<vmem>>, vector<128x512xi8>
    %9 = arith.sitofp %8 : vector<128x512xi8> to vector<128x512xbf16>
    %cst = arith.constant dense<0.000000e+00> : vector<128x128xf32>
    %10 = tpu.matmul %9, %6, %cst {dimension_numbers = #tpu.dot_dimension_numbers<[1], [0], [0], [1], [0, 0, 1, 1], [], []>} : vector<128x512xbf16>, vector<512x128xbf16>, vector<128x128xf32> -> vector<128x128xf32>
    %11 = arith.addf %7, %10 : vector<128x128xf32>
    %c0_5 = arith.constant 0 : index
    %c0_6 = arith.constant 0 : index
    %12 = vector.load %arg13[%c0_5, %c0_6] : memref<128x128xf32, #tpu.memory_space<vmem>>, vector<128x128xf32>
    tpu.vector_store %arg13[%c0_5, %c0_6], %11 {strides = array<i32>} : memref<128x128xf32, #tpu.memory_space<vmem>>, vector<128x128xf32>,
    %c0_i32_7 = arith.constant 0 : i32
    %13 = arith.cmpi eq, %arg1, %c0_i32_7 : i32
    %14 = arith.extui %13 : i1 to i32
    %c0_i32_8 = arith.constant 0 : i32
    %15 = arith.cmpi ne, %14, %c0_i32_8 : i32
    scf.if %15 {
      %c0_9 = arith.constant 0 : index
      %c0_10 = arith.constant 0 : index
      %16 = vector.load %arg13[%c0_9, %c0_10] : memref<128x128xf32, #tpu.memory_space<vmem>>, vector<128x128xf32>
      %c0_11 = arith.constant 0 : index
      %c0_12 = arith.constant 0 : index
      %17 = vector.load %arg5[%c0_11, %c0_12] : memref<128x1xf32, #tpu.memory_space<vmem>>, vector<128x1xf32>
      %18 = vector.broadcast %17 : vector<128x1xf32> to vector<128x128xf32>
      %19 = arith.mulf %16, %18 : vector<128x128xf32>
      %20 = arith.truncf %19 : vector<128x128xf32> to vector<128x128xbf16>
      %c0_13 = arith.constant 0 : index
      %c0_14 = arith.constant 0 : index
      %21 = vector.load %arg8[%c0_13, %c0_14] : memref<128x128xbf16, #tpu.memory_space<vmem>>, vector<128x128xbf16>
      %cst_15 = arith.constant dense<0.000000e+00> : vector<128x128xf32>
      %22 = tpu.matmul %20, %21, %cst_15 {dimension_numbers = #tpu.dot_dimension_numbers<[1], [0], [0], [1], [0, 0, 1, 1], [], []>} : vector<128x128xbf16>, vector<128x128xbf16>, vector<128x128xf32> -> vector<128x128xf32>
      %c0_16 = arith.constant 0 : index
      %c0_17 = arith.constant 0 : index
      %23 = vector.load %arg9[%c0_16, %c0_17] : memref<1x128xf32, #tpu.memory_space<vmem>>, vector<1x128xf32>
      %24 = vector.broadcast %23 : vector<1x128xf32> to vector<128x128xf32>
      %25 = arith.addf %22, %24 : vector<128x128xf32>
      %cst_18 = arith.constant 0.000000e+00 : f32
      %26 = vector.broadcast %cst_18 : f32 to vector<128x128xf32>
      %27 = arith.maximumf %25, %26 : vector<128x128xf32>
      %c0_19 = arith.constant 0 : index
      %c0_20 = arith.constant 0 : index
      %28 = vector.load %arg14[%c0_19, %c0_20] : memref<128x128xf32, #tpu.memory_space<vmem>>, vector<128x128xf32>
      %cst_21 = arith.constant dense<0.000000e+00> : vector<128xf32>
      %29 = vector.multi_reduction <add>, %28, %cst_21 [1] : vector<128x128xf32> to vector<128xf32>
      %30 = vector.shape_cast %29 : vector<128xf32> to vector<128x1xf32>
      %cst_22 = arith.constant dense<0.000000e+00> : vector<128xf32>
      %31 = vector.multi_reduction <add>, %27, %cst_22 [1] : vector<128x128xf32> to vector<128xf32>
      %32 = vector.shape_cast %31 : vector<128xf32> to vector<128x1xf32>
      %33 = arith.addf %30, %32 : vector<128x1xf32>
      %cst_23 = arith.constant 3.906250e-03 : f32
      %34 = vector.broadcast %cst_23 : f32 to vector<128x1xf32>
      %35 = arith.mulf %33, %34 : vector<128x1xf32>
      %36 = vector.broadcast %35 : vector<128x1xf32> to vector<128x128xf32>
      %37 = arith.subf %28, %36 : vector<128x128xf32>
      %38 = vector.broadcast %35 : vector<128x1xf32> to vector<128x128xf32>
      %39 = arith.subf %27, %38 : vector<128x128xf32>
      %40 = arith.mulf %37, %37 : vector<128x128xf32>
      %cst_24 = arith.constant dense<0.000000e+00> : vector<128xf32>
      %41 = vector.multi_reduction <add>, %40, %cst_24 [1] : vector<128x128xf32> to vector<128xf32>
      %42 = vector.shape_cast %41 : vector<128xf32> to vector<128x1xf32>
      %43 = arith.mulf %39, %39 : vector<128x128xf32>
      %cst_25 = arith.constant dense<0.000000e+00> : vector<128xf32>
      %44 = vector.multi_reduction <add>, %43, %cst_25 [1] : vector<128x128xf32> to vector<128xf32>
      %45 = vector.shape_cast %44 : vector<128xf32> to vector<128x1xf32>
      %46 = arith.addf %42, %45 : vector<128x1xf32>
      %cst_26 = arith.constant 3.906250e-03 : f32
      %47 = vector.broadcast %cst_26 : f32 to vector<128x1xf32>
      %48 = arith.mulf %46, %47 : vector<128x1xf32>
      %cst_27 = arith.constant 9.99999974E-6 : f32
      %49 = vector.broadcast %cst_27 : f32 to vector<128x1xf32>
      %50 = arith.addf %48, %49 : vector<128x1xf32>
      %51 = math.rsqrt %50 : vector<128x1xf32>
      %52 = vector.broadcast %51 : vector<128x1xf32> to vector<128x128xf32>
      %53 = arith.mulf %37, %52 : vector<128x128xf32>
      %c0_28 = arith.constant 0 : index
      %c0_29 = arith.constant 0 : index
      %54 = vector.load %arg10[%c0_28, %c0_29] : memref<1x256xf32, #tpu.memory_space<vmem>>, vector<1x128xf32>
      %55 = vector.broadcast %54 : vector<1x128xf32> to vector<128x128xf32>
      %56 = arith.mulf %53, %55 : vector<128x128xf32>
      %c0_30 = arith.constant 0 : index
      %c0_31 = arith.constant 0 : index
      %57 = vector.load %arg11[%c0_30, %c0_31] : memref<1x256xf32, #tpu.memory_space<vmem>>, vector<1x128xf32>
      %58 = vector.broadcast %57 : vector<1x128xf32> to vector<128x128xf32>
      %59 = arith.addf %56, %58 : vector<128x128xf32>
      %c0_32 = arith.constant 0 : index
      %c0_33 = arith.constant 0 : index
      %60 = vector.load %arg12[%c0_32, %c0_33] : memref<128x256xf32, #tpu.memory_space<vmem>>, vector<128x128xf32>
      tpu.vector_store %arg12[%c0_32, %c0_33], %59 {strides = array<i32>} : memref<128x256xf32, #tpu.memory_space<vmem>>, vector<128x128xf32>,
      %61 = vector.broadcast %51 : vector<128x1xf32> to vector<128x128xf32>
      %62 = arith.mulf %39, %61 : vector<128x128xf32>
      %c0_34 = arith.constant 0 : index
      %c128 = arith.constant 128 : index
      %63 = vector.load %arg10[%c0_34, %c128] : memref<1x256xf32, #tpu.memory_space<vmem>>, vector<1x128xf32>
      %64 = vector.broadcast %63 : vector<1x128xf32> to vector<128x128xf32>
      %65 = arith.mulf %62, %64 : vector<128x128xf32>
      %c0_35 = arith.constant 0 : index
      %c128_36 = arith.constant 128 : index
      %66 = vector.load %arg11[%c0_35, %c128_36] : memref<1x256xf32, #tpu.memory_space<vmem>>, vector<1x128xf32>
      %67 = vector.broadcast %66 : vector<1x128xf32> to vector<128x128xf32>
      %68 = arith.addf %65, %67 : vector<128x128xf32>
      %c0_37 = arith.constant 0 : index
      %c128_38 = arith.constant 128 : index
      %69 = vector.load %arg12[%c0_37, %c128_38] : memref<128x256xf32, #tpu.memory_space<vmem>>, vector<128x128xf32>
      tpu.vector_store %arg12[%c0_37, %c128_38], %68 {strides = array<i32>} : memref<128x256xf32, #tpu.memory_space<vmem>>, vector<128x128xf32>,
    } else {
    }
    return
  }
  func.func @transform_0(%arg0: i32, %arg1: i32) -> (i32, i32) {
    %c0_i32 = arith.constant 0 : i32
    return %arg0, %arg1 : i32, i32
  }
  func.func @transform_1(%arg0: i32, %arg1: i32) -> (i32, i32) {
    %c0_i32 = arith.constant 0 : i32
    %c0_i32_0 = arith.constant 0 : i32
    %c0_i32_1 = arith.constant 0 : i32
    return %c0_i32, %c0_i32_0 : i32, i32
  }
  func.func @transform_2(%arg0: i32, %arg1: i32) -> (i32, i32) {
    %c0_i32 = arith.constant 0 : i32
    %c0_i32_0 = arith.constant 0 : i32
    return %arg0, %c0_i32 : i32, i32
  }
  func.func @transform_3(%arg0: i32, %arg1: i32) -> (i32, i32) {
    %c0_i32 = arith.constant 0 : i32
    %c0_i32_0 = arith.constant 0 : i32
    return %arg0, %c0_i32 : i32, i32
  }
  func.func @transform_4(%arg0: i32, %arg1: i32) -> (i32, i32) {
    %c0_i32 = arith.constant 0 : i32
    %c0_i32_0 = arith.constant 0 : i32
    %c0_i32_1 = arith.constant 0 : i32
    return %c0_i32, %c0_i32_0 : i32, i32
  }
  func.func @transform_5(%arg0: i32, %arg1: i32) -> (i32, i32) {
    %c0_i32 = arith.constant 0 : i32
    %c0_i32_0 = arith.constant 0 : i32
    %c0_i32_1 = arith.constant 0 : i32
    return %c0_i32, %c0_i32_0 : i32, i32
  }
  func.func @transform_6(%arg0: i32, %arg1: i32) -> (i32, i32) {
    %c0_i32 = arith.constant 0 : i32
    %c0_i32_0 = arith.constant 0 : i32
    %c0_i32_1 = arith.constant 0 : i32
    return %c0_i32, %c0_i32_0 : i32, i32
  }
  func.func @transform_7(%arg0: i32, %arg1: i32) -> (i32, i32) {
    %c0_i32 = arith.constant 0 : i32
    %c0_i32_0 = arith.constant 0 : i32
    %c0_i32_1 = arith.constant 0 : i32
    return %c0_i32, %c0_i32_0 : i32, i32
  }
  func.func @transform_8(%arg0: i32, %arg1: i32) -> (i32, i32) {
    %c0_i32 = arith.constant 0 : i32
    %c0_i32_0 = arith.constant 0 : i32
    %c0_i32_1 = arith.constant 0 : i32
    return %c0_i32, %c0_i32_0 : i32, i32
  }
  func.func @transform_9(%arg0: i32, %arg1: i32) -> (i32, i32) {
    %c0_i32 = arith.constant 0 : i32
    %c0_i32_0 = arith.constant 0 : i32
    %c0_i32_1 = arith.constant 0 : i32
    return %c0_i32, %c0_i32_0 : i32, i32
  }
  func.func @transform_10(%arg0: i32, %arg1: i32) -> (i32, i32) {
    %c0_i32 = arith.constant 0 : i32
    %c0_i32_0 = arith.constant 0 : i32
    return %arg0, %c0_i32 : i32, i32
  }
}

</mosaic_0001>

<bundles_post_ra>
// kernel: tpu_custom_call.1
= control target key start
LH: loop header
LB: loop body
LE: loop exit
PB: predicated region body
PF: predicated region fallthrough
CT: control target
= control target key end

     0   :  { %s3868_s0 = inlined_call_operand.vmem [shape: s8[256,512], index: 0, kind: input, shape index: {}]   ;;  %s3869_s1 = inlined_call_operand.hbm [shape: bf16[512,128], index: 1, kind: input, shape index: {}]   ;;  %s3870_s2 = inlined_call_operand.hbm [shape: bf16[256,128], index: 2, kind: input, shape index: {}]   ;;  %s3871_s3 = inlined_call_operand.vmem [shape: f32[256,1], index: 3, kind: input, shape index: {}]   ;;  %s3872_s4 = inlined_call_operand.hbm [shape: bf16[128,128], index: 4, kind: input, shape index: {}]   ;;  %s3873_s5 = inlined_call_operand.vmem [shape: f32[1,128], index: 5, kind: input, shape index: {}]   ;;  %s3874_s6 = inlined_call_operand.hbm [shape: bf16[128,128], index: 6, kind: input, shape index: {}]   ;;  %s3875_s7 = inlined_call_operand.vmem [shape: f32[1,128], index: 7, kind: input, shape index: {}]   ;;  %s3876_s8 = inlined_call_operand.vmem [shape: f32[1,256], index: 8, kind: input, shape index: {}]   ;;  %s3877_s9 = inlined_call_operand.vmem [shape: f32[1,256], index: 9, kind: input, shape index: {}]   ;;  %s3878_s10 = inlined_call_operand.hbm [shape: f32[256,256], index: 10, kind: output, shape index: {}]  }
   0x1   :  { %3918 = sst [smem:[#allocation21_spill]] %s3869_s1 }
   0x2   :  { %3919 = sst [smem:[#allocation22_spill]] %s3872_s4 }
   0x3   :  { %3920 = sst [smem:[#allocation23_spill]] %s3874_s6 }
   0x4   :  { %3921 = sst [smem:[#allocation24_spill]] %s3877_s9 }
   0x5   :  { %3922 = sst [smem:[#allocation25_spill]] %s3878_s10 }
   0x6   :  { %15 = vsyncpa [#allocation5], 0 }
   0x7   :  { %16 = vsyncpa [#allocation8], 0 }
   0x8   :  { %18 = vsyncpa [#allocation8 + $0x1], 0 }
   0x9   :  { %19 = vsyncpa [#allocation11], 0 }
   0xa   :  { %20 = vsyncpa [#allocation6], 0 }
   0xb   :  { %22 = vsyncpa [#allocation6 + $0x1], 0  ;;  %s3047_s13 = smov 0   ;;  %s3049_s14 = smov 0  }
   0xc   :  { %s3051_s15 = smov 0   ;;  %s3053_s16 = smov 0  }
   0xd   :  { %s3055_s17 = smov 0   ;;  %s3057_s18 = smov 0  }
   0xe LB: > { %3923 = sst [smem:[#allocation18_spill]] %s2960_s13  ;;  %s3078_s19 = sadd.s32 4294967295, %s2980_s18   ;;  %s2980_s18 = sphi %s3057_s18, %s28_s18   ;;  %s2976_s17 = sphi %s3055_s17, %s3985_s17   ;;  %s2972_s16 = sphi %s3053_s16, %s3984_s16   ;;  %s2968_s15 = sphi %s3051_s15, %s3983_s15   ;;  %s2964_s14 = sphi %s3049_s14, %s3982_s14   ;;  %s2960_s13 = sphi %s3047_s13, %s3981_s13  }
   0xf   : > { %s2278_s20 = sadd.s32 4294967294, %s2980_s18   ;;  %p103_p0 = scmp.ne.s32.totalorder %s2968_s15, %s2964_s14 }
  0x10   : > { %p104_p1 = scmp.eq.s32.totalorder %s2980_s18, 0  ;;  %p109_p2 = scmp.ne.s32.totalorder %s2964_s14, %s2960_s13 }
  0x11   : > { %p3879_p3 = scmp.eq.s32.totalorder %s3078_s19, 0  ;;  %p285_p5 = scmp.eq.s32.totalorder %s3078_s19, 1 }
  0x12   : > { %p3087_p4 = por %p104_p1, %p103_p0  ;;  %p291_p7 = scmp.eq.s32.totalorder %s2278_s20, 1 }
  0x13   : > { %p3094_p6 = por %p3879_p3, %p109_p2  ;;  %p3098_p8 = por %p285_p5, %p103_p0 }
  0x14   : > { %p2279_p9 = scmp.ge.s32.totalorder %s2980_s18, 1  ;;  %p3103_p10 = por %p291_p7, %p109_p2 }
  0x15   : > { %s3926_s23 = scalar_select %p3098_p8, 1, 0 }
  0x16   : > { %s3928_s24 = scalar_select %p3103_p10, 1, 0 }
  0x17   : > { %3927 = sst [smem:[#allocation19_spill]] %s3926_s23  ;;  %p298_p11 = scmp.lt.s32.totalorder %s2980_s18, 3 }
  0x18   : > { %3929 = sst [smem:[#allocation20_spill]] %s3928_s24  ;;  %s2982_s26 = smov [#allocation9]  }
  0x19   : > { %p3108_p12 = pnand %p2279_p9, %p298_p11  ;;  %s323_s27 = sshll.u32 %s2982_s26, 4  ;;  %s324_s27 = int_to_ptr.vmem [resolvable:$true] %s323_s27 }
  0x1a   : > { %p2631_p0 = scmp.lt.s32.totalorder %s2980_s18, 2  ;;  %s2793_s30 = scalar_lea.vmem %s324_s27, 1024 }
  0x1b   : > { %p2610_p1 = pneg %p3108_p12  ;;  %p2794_p9 = scmp.ne.s32.totalorder %s324_s27, %s2793_s30 }
  0x1c   : > { %p3124_p2 = pnand %p2631_p0, %p3087_p4  ;;  %p2801_p10 = scmp.lt.s32.totalorder %s324_s27, %s324_s27 }
  0x1d   : > { %p3118_p5 = pnand %p2610_p1, %p3879_p3  ;;  %p2802_p1 = scmp.lt.s32.totalorder %s2793_s30, %s2793_s30 }
  0x1f   : > { %p2784_p7 = pneg %p3118_p5  ;;  %p2803_p3 = por %p2802_p1, %p2801_p10 }
  0x21   : > { %p2796_p11 = pnand %p2794_p9, %p2784_p7 }
  0x23   : > { %p2797_p13 = pneg %p2796_p11 }
  0x25   : > { %p2804_p8 = pnand %p2803_p3, %p2797_p13 }
  0x27   : > { %2807 = shalt.err (!%p2804_p8)
}
  0x28   : > { %s3887_s11 = smov 64   ;;  %s3888_s12 = smov 4  }
  0x29   : > { %s3933_s4 = sld [smem:[#allocation22_spill]]  ;;  %s2985_s26 = smov [#allocation4]  }
  0x2a   : > { %s310_s24 = sshll.u32 %s2985_s26, 4  ;;  %s311_s24 = int_to_ptr.vmem [resolvable:$true] %s310_s24 }
  0x2b   : > { %s2819_s13 = scalar_lea.vmem %s311_s24, 4096  ;;  %p2827_p10 = scmp.lt.s32.totalorder %s311_s24, %s311_s24 }
  0x2c   : > { %p2820_p4 = scmp.ne.s32.totalorder %s311_s24, %s2819_s13  ;;  %p2828_p13 = scmp.lt.s32.totalorder %s2819_s13, %s2819_s13 }
  0x2e   : > { %p2822_p3 = pnand %p2820_p4, %p2784_p7  ;;  %p2829_p0 = por %p2828_p13, %p2827_p10 }
  0x2f   : > { %2616 = dma.hbm_to_vmem [thread:$0]  (!%p3118_p5), %s3933_s4, 1024, %s324_s27, [#allocation8], %s3887_s11, %s3887_s11, %s3888_s12  }
  0x30   : > { %p2823_p8 = pneg %p2822_p3 }
  0x32   : > { %p2830_p9 = pnand %p2829_p0, %p2823_p8 }
  0x34   : > { %2833 = shalt.err (!%p2830_p9)
}
  0x35   : > { %s3934_s1 = sld [smem:[#allocation21_spill]]  ;;  %s2986_s20 = smov [#allocation10]  }
  0x36   : > { %s339_s21 = sshll.u32 %s2986_s20, 4  ;;  %s340_s21 = int_to_ptr.vmem [resolvable:$true] %s339_s21 }
  0x37   : > { %s2845_s26 = scalar_lea.vmem %s340_s21, 1024  ;;  %p2853_p3 = scmp.lt.s32.totalorder %s340_s21, %s340_s21 }
  0x38   : > { %p2846_p11 = scmp.ne.s32.totalorder %s340_s21, %s2845_s26  ;;  %p2854_p8 = scmp.lt.s32.totalorder %s2845_s26, %s2845_s26 }
  0x3a   : > { %p2848_p1 = pnand %p2846_p11, %p2784_p7  ;;  %p2855_p10 = por %p2854_p8, %p2853_p3 }
  0x3b   : > { %2613 = dma.hbm_to_vmem [thread:$0]  (!%p3118_p5), %s3934_s1, 4096, %s311_s24, [#allocation5], %s3887_s11, %s3887_s11, %s3888_s12  }
  0x3c   : > { %p2849_p4 = pneg %p2848_p1 }
  0x3e   : > { %p2856_p13 = pnand %p2855_p10, %p2849_p4 }
  0x40   : > { %2859 = shalt.err (!%p2856_p13)
}
  0x41   : > { %s3935_s6 = sld [smem:[#allocation23_spill]]  ;;  %s40_s27 = sadd.s32 1, %s2976_s17 }
  0x42   : > { %p42_p7 = scmp.ge.s32.totalorder %s40_s27, 2  ;;  %s96_s30 = sadd.s32 1, %s2968_s15 }
  0x43   : > { %s377_s20 = sand.u32 1, %s2980_s18   ;;  %s379_s28 = sand.u32 1, %s2968_s15  }
  0x44   : > { %s3987_s27 = smov (%p42_p7, %s40_s27), 0  ;;  %s2284_s26 = sshll.u32 %s379_s28, 6 }
  0x45   : > { %s2366_s1 = sshll.u32 %s2976_s17, 10  ;;  %s93_s13 = ssub.s32 %s2976_s17, %s3987_s27 }
  0x46   : > { %p94_p0 = scmp.eq.s32.totalorder %s93_s13, 0  ;;  %s387_s10 = scalar_lea.hbm %s3870_s2, %s2366_s1 }
  0x47   : > { %2619 = dma.hbm_to_vmem [thread:$0]  (!%p3118_p5), %s3935_s6, 1024, %s340_s21, [#allocation11], %s3887_s11, %s3887_s11, %s3888_s12  }
  0x48   : > { %s381_s23 = scalar_lea.vmem [#allocation7], %s2284_s26  ;;  %s378_s11 = scalar_lea.sflag [#allocation8], %s377_s20 }
  0x49   : > { %s388_s9 = sshll.u32 %s381_s23, 4  ;;  %p2862_p5 = pneg %p3124_p2  ;;  %s389_s9 = int_to_ptr.vmem [resolvable:$true] %s388_s9 }
  0x4a   : > { %s3176_s21 = scalar_select %p94_p0, %s2968_s15, %s96_s30  }
  0x4b   : > { %s2873_s12 = scalar_lea.vmem %s389_s9, 1024  ;;  %s2987_s28 = smov [#allocation7]  }
  0x4c   : > { %p2874_p9 = scmp.ne.s32.totalorder %s389_s9, %s2873_s12  ;;  %s2878_s6 = sshll.u32 %s2987_s28, 4  ;;  %s2879_s6 = int_to_ptr.vmem [resolvable:$false] %s2878_s6 }
  0x4d   : > { %s2880_s13 = scalar_lea.vmem %s2879_s6, 2048  ;;  %p2881_p4 = scmp.lt.s32.totalorder %s389_s9, %s2879_s6 }
  0x4e   : > { %p2876_p11 = pnand %p2874_p9, %p2862_p5  ;;  %p2882_p3 = scmp.lt.s32.totalorder %s2880_s13, %s2873_s12 }
  0x50   : > { %p2877_p1 = pneg %p2876_p11  ;;  %p2883_p8 = por %p2882_p3, %p2881_p4 }
  0x52   : > { %p2884_p10 = pnand %p2883_p8, %p2877_p1 }
  0x54   : > { %2887 = shalt.err (!%p2884_p10)
}
  0x55   : > { %s3936_s1 = smov 4   ;;  %s3937_s4 = smov 64  }
  0x56   : > { %2623 = dma.hbm_to_vmem [thread:$0]  (!%p3124_p2), %s387_s10, 1024, %s389_s9, %s378_s11, %s3937_s4, %s3937_s4, %s3936_s1  }
  0x57   : > { %409 = sbr.rel (%p3108_p12) target bundleno = 975 (0x3cf), region = 60  ;;  %p3938_p13 = scmp.eq.s32.totalorder (!%p3108_p12), %s3078_s19, 0 }
  0x5c   : > { %2939 = dma.done.wait (%p3938_p13), [#allocation5], 4096   ;;  %p3939_p7 = pmov %p3938_p13 }
  0x5d   : > { %s415_s6 = sand.u32 1, %s3078_s19   ;;  %s3193_s23 = sand.u32 1, %s2964_s14  }
  0x5e   : > { %2941 = vsyncadd (%p3939_p7), [#allocation5], 4294963200  ;;  %s2289_s29 = sshll.u32 %s3193_s23, 6  ;;  %s416_s12 = scalar_lea.sflag [#allocation8], %s415_s6 }
  0x5f   : > { %s3196_s30 = scalar_lea.vmem [#allocation7], %s2289_s29 }
  0x60   : > { %2943 = dma.done.wait (%p3094_p6), %s416_s12, 1024  }
  0x61   : > { %2945 = vsyncadd (%p3094_p6), %s416_s12, 4294966272  ;;  %p3940_p12 = pmov %p3939_p7 }
  0x62   : > { %p3941_p2 = pmov %p3939_p7 }
  0x63   : > { %2947 = dma.done.wait (%p3940_p12), [#allocation8], 1024  }
  0x64   : > { %2949 = vsyncadd (%p3941_p2), [#allocation8], 4294966272  ;;  %p3942_p0 = pmov %p3941_p2 }
  0x66   : > { %2951 = dma.done.wait (%p3942_p0), [#allocation11], 1024   ;;  %p3943_p5 = pmov %p3942_p0 }
  0x67   : > { %v2988_v0 = vmov 0   ;;  %v2694_v1 = vld [vmem:[#allocation9 + $0x38] sm:$0xff]   ;;  %v2695_v2 = vld [vmem:[#allocation9 + $0x30] sm:$0xff]   ;;  %v2696_v3 = vld [vmem:[#allocation9 + $0x28] sm:$0xff]   ;;  %s2293_s9 = sshll.u32 %s2972_s16, 2  ;;  %s2296_s10 = sshll.u32 %s2972_s16, 4 }
  0x68   : > { %2953 = vsyncadd (%p3943_p5), [#allocation11], 4294966272  ;;  %2692 = vset.pattern.permute.xlu0 %v2988_v0  ;;  %2693 = vset.pattern.permute.xlu1 %v2988_v0  ;;  %v2701_v4 = vld [vmem:[#allocation4 + $0x78] sm:$0xff]   ;;  %v2697_v5 = vld [vmem:[#allocation9 + $0x20] sm:$0xff]   ;;  %p481_p6 = scmp.lt.s32.totalorder %s2293_s9, 7  ;;  %p493_p9 = scmp.lt.s32.totalorder %s2296_s10, 31 }
  0x69   : > { %2530 = vmatprep.subr.bf16.mxu0 %v2694_v1  ;;  %2386 = vmatprep.subr.bf16.mxu1 %v2701_v4  ;;  %v2703_v6 = vld [vmem:[#allocation4 + $0x38] sm:$0xff]   ;;  %v2704_v7 = vld [vmem:[%s3196_s30] sm:$0xff]   ;;  %v2705_v8 = vld [vmem:[#allocation4 + $0x70] sm:$0xff]   ;;  %s3973_s25 = sld [smem:[#allocation24_spill]]  ;;  %s2369_s24 = sshll.u32 %s2972_s16, 12 }
  0x6a   : > { %2531 = vmatpush3.bf16.msra.mxu0 %v2694_v1  ;;  %2387 = vmatpush3.bf16.msra.mxu1 %v2703_v6  ;;  %v2698_v9 = vld [vmem:[#allocation9 + $0x18] sm:$0xff]   ;;  %v2707_v10 = vld [vmem:[#allocation4 + $0x30] sm:$0xff]   ;;  %v2710_v12 = vld [vmem:[#allocation4 + $0x68] sm:$0xff]   ;;  %s3989_s9 = smov (!%p481_p6, %s2293_s9), 7  ;;  %s3991_s10 = smov (!%p493_p9, %s2296_s10), 31 }
  0x6b   : > { %2532 = vmatprep.subr.bf16.mxu0 %v2695_v2  ;;  %2546 = vmatprep.mubr.bf16.mxu0 %v2704_v7  ;;  %v2699_v11 = vld [vmem:[#allocation9 + $0x10] sm:$0xff]   ;;  %v2711_v13 = vld [vmem:[#allocation4 + $0x28] sm:$0xff]   ;;  %v2715_v15 = vld [vmem:[#allocation4 + $0x60] sm:$0xff]   ;;  %s2367_s19 = sshll.u32 %s3989_s9, 5  ;;  %s2297_s20 = sshll.u32 %s3991_s10, 3 }
  0x6c   : > { %2388 = vmatprep.subr.bf16.mxu1 %v2705_v8  ;;  %v2700_v14 = vld [vmem:[#allocation9 + $0x8] sm:$0xff]   ;;  %v2717_v16 = vld [vmem:[#allocation4 + $0x20] sm:$0xff]   ;;  %v2720_v18 = vld [vmem:[#allocation4 + $0x58] sm:$0xff]   ;;  %s3220_s11 = scalar_lea.vmem %s3868_s0, %s2367_s19  ;;  %s3229_s28 = scalar_lea.vmem %s3871_s3, %s2297_s20 }
  0x6d   : > { %v2702_v17 = vld [vmem:[#allocation9] sm:$0xff]   ;;  %v2721_v19 = vld [vmem:[#allocation4 + $0x18] sm:$0xff]   ;;  %v2706_v20 = vld [vmem:[%s3196_s30 + $0x8] sm:$0xff]   ;;  %s2292_s10 = sshll.u32 %s3193_s23, 8  ;;  %s3974_s13 = sld [smem:[#allocation19_spill]] }
  0x6e   : > { %2533 = vmatpush3.bf16.msra.mxu0 %v2695_v2  ;;  %2389 = vmatpush3.bf16.msra.mxu1 %v2707_v10  ;;  %v2708_v21 = vld [vmem:[#allocation4 + $0xf8] sm:$0xff]   ;;  %v2714_v23 = vld [vmem:[%s3196_s30 + $0x10] sm:$0xff]   ;;  %v2718_v28 = vld [vmem:[#allocation4 + $0xe8] sm:$0xff]   ;;  %s3691_s26 = scalar_lea.vmem [#allocation12], %s2292_s10  ;;  %s3975_s6 = sld [smem:[#allocation25_spill]] }
  0x6f   : > { %2534 = vmatprep.subr.bf16.mxu0 %v2696_v3  ;;  %2390 = vmatprep.subr.bf16.mxu1 %v2710_v12  ;;  %v2709_v22 = vld [vmem:[#allocation4 + $0xb8] sm:$0xff]   ;;  %v2725_v24 = vld [vmem:[#allocation4 + $0x50] sm:$0xff]   ;;  %v2730_v30 = vld [vmem:[#allocation4 + $0x48] sm:$0xff]   ;;  %s2119_s16 = scalar_lea.sflag [#allocation6], %s3193_s23 }
  0x70   : > { %v2712_v25 = vld [vmem:[#allocation4 + $0xf0] sm:$0xff]   ;;  %v2716_v29 = vld [vmem:[%s3196_s30 + $0x18] sm:$0xff]   ;;  %v2731_v31 = vld [vmem:[#allocation4 + $0x8] sm:$0xff]  }
  0x71   : > { %v2727_v26 = vld [vmem:[#allocation4 + $0x10] sm:$0xff]   ;;  %v2719_v32 = vld [vmem:[#allocation4 + $0xa8] sm:$0xff]   ;;  %v2724_v33 = vld [vmem:[%s3196_s30 + $0x20] sm:$0xff]  }
  0x72   : > { %2535 = vmatpush3.bf16.msra.mxu0 %v2696_v3  ;;  %2391 = vmatpush3.bf16.msra.mxu1 %v2711_v13  ;;  %v2713_v27 = vld [vmem:[#allocation4 + $0xb0] sm:$0xff]   ;;  %v2722_v34 = vld [vmem:[#allocation4 + $0xe0] sm:$0xff]   ;;  %v2726_v38 = vld [vmem:[%s3196_s30 + $0x28] sm:$0xff]  }
  0x73   : > { %2536 = vmatprep.subr.bf16.mxu0 %v2697_v5  ;;  %2392 = vmatprep.subr.bf16.mxu1 %v2715_v15  ;;  %v2735_v35 = vld [vmem:[#allocation4 + $0x40] sm:$0xff]   ;;  %v2728_v39 = vld [vmem:[#allocation4 + $0xd8] sm:$0xff]   ;;  %v870_v41 = vld [vmem:[%s3220_s11 + $0x8] sm:$0xff]  ;;  %p3976_p1 = scmp.ne.s32.totalorder %s3974_s13, 0 }
  0x74   : > { %v2723_v36 = vld [vmem:[#allocation4 + $0xa0] sm:$0xff]   ;;  %v2729_v40 = vld [vmem:[#allocation4 + $0x98] sm:$0xff]   ;;  %v2734_v43 = vld [vmem:[%s3196_s30 + $0x30] sm:$0xff]   ;;  %v886_v44 = vunpack.c.l.s8.bf16 %v870_v41  ;;  %v890_v47 = vunpack.c.h.s8.bf16 %v870_v41  ;;  %s3814_s29 = scalar_lea.hbm %s3975_s6, %s2369_s24 }
  0x75   : > { %v2737_v37 = vld [vmem:[#allocation4] sm:$0xff]   ;;  %v2732_v46 = vld [vmem:[#allocation4 + $0xd0] sm:$0xff]   ;;  %v2738_v49 = vld [vmem:[#allocation4 + $0xc8] sm:$0xff]  }
  0x76   : > { %2537 = vmatpush3.bf16.msra.mxu0 %v2697_v5  ;;  %2393 = vmatpush3.bf16.msra.mxu1 %v2717_v16  ;;  %v869_v42 = vld [vmem:[%s3220_s11] sm:$0xff]  ;;  %v2733_v48 = vld [vmem:[#allocation4 + $0x90] sm:$0xff]   ;;  %v872_v50 = vld [vmem:[%s3220_s11 + $0x18] sm:$0xff] }
  0x77   : > { %2538 = vmatprep.subr.bf16.mxu0 %v2698_v9  ;;  %2394 = vmatprep.subr.bf16.mxu1 %v2720_v18  ;;  %v885_v45 = vunpack.c.l.s8.bf16 %v869_v42  ;;  %v874_v51 = vld [vmem:[%s3220_s11 + $0x28] sm:$0xff]  ;;  %v1354_v52 = vld [vmem:[%s3229_s28] sm:$0xff]  ;;  %v1356_v53 = vld [vmem:[%s3229_s28 + $0x10] sm:$0xff]  ;;  %v889_v55 = vunpack.c.h.s8.bf16 %v869_v42  ;;  %v888_v57 = vunpack.c.l.s8.bf16 %v872_v50  ;;  %v892_v6 = vunpack.c.h.s8.bf16 %v872_v50 }
  0x78   : > { %1141 = vmatprep.mubr.bf16.mxu1 %v886_v44  ;;  %v2736_v54 = vld [vmem:[%s3196_s30 + $0x38] sm:$0xff]   ;;  %1372 = vperm.xlu0 %2692, %v1354_v52   ;;  %v2739_v56 = vld [vmem:[#allocation4 + $0x88] sm:$0xff]   ;;  %v2740_v58 = vld [vmem:[#allocation4 + $0xc0] sm:$0xff]   ;;  %v894_v59 = vunpack.c.l.s8.bf16 %v874_v51  ;;  %v898_v7 = vunpack.c.h.s8.bf16 %v874_v51  ;;  %s2989_s30 = smov [#allocation12]  }
  0x79   : > { %1382 = vperm.xlu1 %2693, %v1356_v53   ;;  %v2741_v60 = vld [vmem:[#allocation4 + $0x80] sm:$0xff]   ;;  %v871_v61 = vld [vmem:[%s3220_s11 + $0x10] sm:$0xff]  ;;  %v1355_v63 = vld [vmem:[%s3229_s28 + $0x8] sm:$0xff]  ;;  %s2892_s9 = sshll.u32 %s2989_s30, 4  ;;  %s2893_s9 = int_to_ptr.vmem [resolvable:$false] %s2892_s9 }
  0x7a   : > { %2539 = vmatpush3.bf16.msra.mxu0 %v2698_v9  ;;  %2395 = vmatpush3.bf16.msra.mxu1 %v2721_v19  ;;  %v873_v62 = vld [vmem:[%s3220_s11 + $0x20] sm:$0xff]  ;;  %v1357_v0 = vld [vmem:[%s3229_s28 + $0x18] sm:$0xff]  ;;  %v1359_v3 = vld [vmem:[%s3229_s28 + $0x28] sm:$0xff]  ;;  %v887_v4 = vunpack.c.l.s8.bf16 %v871_v61  ;;  %v891_v12 = vunpack.c.h.s8.bf16 %v871_v61  ;;  %s2894_s10 = scalar_lea.vmem %s2893_s9, 8192 }
  0x7b   : > { %2540 = vmatprep.subr.bf16.mxu0 %v2699_v11  ;;  %2396 = vmatprep.subr.bf16.mxu1 %v2725_v24  ;;  %v2742_v1 = vld [vmem:[#allocation10 + $0x38] sm:$0xff]   ;;  %v1358_v2 = vld [vmem:[%s3229_s28 + $0x20] sm:$0xff]  ;;  %v893_v5 = vunpack.c.l.s8.bf16 %v873_v62  ;;  %v1360_v8 = vld [vmem:[%s3229_s28 + $0x30] sm:$0xff]  ;;  %v897_v13 = vunpack.c.h.s8.bf16 %v873_v62 }
  0x7c   : > { %1377 = vperm.xlu0 %2692, %v1355_v63   ;;  %v1361_v9 = vld [vmem:[%s3229_s28 + $0x38] sm:$0xff]  ;;  %v1363_v15 = vld [vmem:[%s3229_s28 + $0x48] sm:$0xff]  ;;  %v1364_v18 = vld [vmem:[%s3229_s28 + $0x50] sm:$0xff] }
  0x7d   : > { %1387 = vperm.xlu1 %2693, %v1357_v0   ;;  %v876_v10 = vld [vmem:[%s3220_s11 + $0x38] sm:$0xff]  ;;  %v1366_v24 = vld [vmem:[%s3229_s28 + $0x60] sm:$0xff]  ;;  %v2744_v50 = vld [vmem:[#allocation10 + $0x28] sm:$0xff]  }
  0x7e   : > { %2541 = vmatpush3.bf16.msra.mxu0 %v2699_v11  ;;  %2397 = vmatpush3.bf16.msra.mxu1 %v2727_v26  ;;  %v878_v11 = vld [vmem:[%s3220_s11 + $0x48] sm:$0xff]  ;;  %v896_v16 = vunpack.c.l.s8.bf16 %v876_v10  ;;  %v1365_v19 = vld [vmem:[%s3229_s28 + $0x58] sm:$0xff]  ;;  %v900_v26 = vunpack.c.h.s8.bf16 %v876_v10  ;;  %v2745_v52 = vld [vmem:[#allocation10 + $0x20] sm:$0xff]  }
  0x7f   : > { %2542 = vmatprep.subr.bf16.mxu0 %v2700_v14  ;;  %2398 = vmatprep.subr.bf16.mxu1 %v2730_v30  ;;  %v880_v30 = vld [vmem:[%s3220_s11 + $0x58] sm:$0xff] }
  0x80   : > { %1392 = vperm.xlu0 %2692, %v1358_v2   ;;  %v884_v42 = vld [vmem:[%s3220_s11 + $0x78] sm:$0xff] }
  0x81   : > { %1397 = vperm.xlu1 %2693, %v1359_v3   ;;  %v2746_v53 = vld [vmem:[#allocation10 + $0x18] sm:$0xff]  }
  0x82   : > { %2543 = vmatpush3.bf16.msra.mxu0 %v2700_v14  ;;  %2399 = vmatpush3.bf16.msra.mxu1 %v2731_v31  ;;  %v1362_v14 = vld [vmem:[%s3229_s28 + $0x40] sm:$0xff]  ;;  %v882_v31 = vld [vmem:[%s3220_s11 + $0x68] sm:$0xff] }
  0x83   : > { %2544 = vmatprep.subr.bf16.mxu0 %v2702_v17  ;;  %2400 = vmatprep.subr.bf16.mxu1 %v2735_v35  ;;  %v910_v35 = vunpack.c.l.s8.bf16 %v882_v31  ;;  %v914_v41 = vunpack.c.h.s8.bf16 %v882_v31 }
  0x84   : > { %1402 = vperm.xlu0 %2692, %v1360_v8  }
  0x85   : > { %1407 = vperm.xlu1 %2693, %v1361_v9  }
  0x86   : > { %2545 = vmatpush3.bf16.msra.mxu0 %v2702_v17  ;;  %2401 = vmatpush3.bf16.msra.mxu1 %v2737_v37  ;;  %v902_v17 = vunpack.c.l.s8.bf16 %v878_v11  ;;  %v881_v37 = vld [vmem:[%s3220_s11 + $0x60] sm:$0xff] }
  0x87   : > { %2450 = vmatprep.subr.bf16.mxu0 %v2708_v21  ;;  %2562 = vmatprep.subr.bf16.mxu1 %v2742_v1  ;;  %v877_v21 = vld [vmem:[%s3220_s11 + $0x40] sm:$0xff]  ;;  %v913_v44 = vunpack.c.h.s8.bf16 %v881_v37 }
  0x88   : > { %1412 = vperm.xlu0 %2692, %v1362_v14  }
  0x89   : > { %2547 = vmatmul.mubr.bf16.vlgmr.msra.gmra.mxu0 %v2706_v20  ;;  %1142 = vmatmul.mubr.bf16.vlgmr.msra.gmra.mxu1 %v885_v45  ;;  %v875_v20 = vld [vmem:[%s3220_s11 + $0x30] sm:$0xff]  ;;  %v912_v45 = vunpack.c.l.s8.bf16 %v884_v42 }
  0x8a   : > { %2451 = vmatpush3.bf16.msra.mxu0 %v2709_v22  ;;  %2550 = vmatprep.mubr.bf16.mxu0 %v2714_v23  ;;  %v895_v22 = vunpack.c.l.s8.bf16 %v875_v20  ;;  %v901_v23 = vunpack.c.l.s8.bf16 %v877_v21 }
  0x8b   : > { %2452 = vmatprep.subr.bf16.mxu0 %v2712_v25  ;;  %1149 = vmatprep.mubr.bf16.mxu1 %v890_v47  ;;  %v1367_v25 = vld [vmem:[%s3229_s28 + $0x68] sm:$0xff]  ;;  %v883_v47 = vld [vmem:[%s3220_s11 + $0x70] sm:$0xff] }
  0x8c   : > { %2563 = vmatpush3.bf16.msra.mxu1 %v2742_v1  ;;  %1417 = vperm.xlu1 %2693, %v1363_v15   ;;  %v915_v51 = vunpack.c.h.s8.bf16 %v883_v47 }
  0x8d   : > { %1422 = vperm.xlu0 %2692, %v1364_v18  }
  0x8e   : > { %2453 = vmatpush3.bf16.msra.mxu0 %v2713_v27  ;;  %v906_v27 = vunpack.c.h.s8.bf16 %v878_v11 }
  0x8f   : > { %2454 = vmatprep.subr.bf16.mxu0 %v2718_v28  ;;  %v1368_v28 = vld [vmem:[%s3229_s28 + $0x70] sm:$0xff] }
  0x90   : > { %1427 = vperm.xlu1 %2693, %v1365_v19  }
  0x91   : > { %2551 = vmatmul.mubr.bf16.gmra.mxu0 %v2716_v29  ;;  %1150 = vmatmul.mubr.bf16.gmra.mxu1 %v889_v55  ;;  %v1369_v29 = vld [vmem:[%s3229_s28 + $0x78] sm:$0xff]  ;;  %v2748_v55 = vld [vmem:[#allocation10 + $0x8] sm:$0xff]   ;;  %s2133_s28 = sshll.u32 %s3691_s26, 4  ;;  %s3816_s28 = int_to_ptr.vmem [resolvable:$true] %s2133_s28 }
  0x92   : > { %2455 = vmatpush3.bf16.msra.mxu0 %v2719_v32  ;;  %2554 = vmatprep.mubr.bf16.mxu0 %v2724_v33  ;;  %v899_v32 = vunpack.c.h.s8.bf16 %v875_v20  ;;  %v905_v33 = vunpack.c.h.s8.bf16 %v877_v21  ;;  %s2888_s12 = scalar_lea.vmem %s3816_s28, 4096  ;;  %p2895_p8 = scmp.lt.s32.totalorder %s3816_s28, %s2893_s9 }
  0x93   : > { %2456 = vmatprep.subr.bf16.mxu0 %v2722_v34  ;;  %1157 = vmatprep.mubr.bf16.mxu1 %v894_v59  ;;  %v904_v34 = vunpack.c.l.s8.bf16 %v880_v30  ;;  %p2889_p11 = scmp.ne.s32.totalorder %s3816_s28, %s2888_s12  ;;  %p2896_p10 = scmp.lt.s32.totalorder %s2894_s10, %s2888_s12 }
  0x94   : > { %1432 = vperm.xlu0 %2692, %v1366_v24   ;;  %1437 = vperm.xlu1 %2693, %v1367_v25  }
  0x95   : > { %p2890_p4 = pnand %p2889_p11, %p3976_p1  ;;  %p2897_p13 = por %p2896_p10, %p2895_p8 }
  0x96   : > { %2457 = vmatpush3.bf16.msra.mxu0 %v2723_v36  ;;  %v879_v36 = vld [vmem:[%s3220_s11 + $0x50] sm:$0xff] }
  0x97   : > { %2458 = vmatprep.subr.bf16.mxu0 %v2728_v39  ;;  %v909_v39 = vunpack.c.l.s8.bf16 %v881_v37  ;;  %p2891_p3 = pneg %p2890_p4 }
  0x98   : > { %1442 = vperm.xlu0 %2692, %v1368_v28   ;;  %1447 = vperm.xlu1 %2693, %v1369_v29  }
  0x99   : > { %2555 = vmatmul.mubr.bf16.gmra.mxu0 %v2726_v38  ;;  %1158 = vmatmul.mubr.bf16.gmra.mxu1 %v893_v5  ;;  %v903_v38 = vunpack.c.l.s8.bf16 %v879_v36  ;;  %p2898_p7 = pnand %p2897_p13, %p2891_p3 }
  0x9a   : > { %2459 = vmatpush3.bf16.msra.mxu0 %v2729_v40  ;;  %2558 = vmatprep.mubr.bf16.mxu0 %v2734_v43  ;;  %v908_v40 = vunpack.c.h.s8.bf16 %v880_v30  ;;  %v907_v43 = vunpack.c.h.s8.bf16 %v879_v36 }
  0x9b   : > { %2460 = vmatprep.subr.bf16.mxu0 %v2732_v46  ;;  %1165 = vmatprep.mubr.bf16.mxu1 %v898_v7  ;;  %v2743_v46 = vld [vmem:[#allocation10 + $0x30] sm:$0xff]  }
  0x9c   : > { %2564 = vmatprep.subr.bf16.mxu1 %v2743_v46 }
  0x9d   : > { %2565 = vmatpush3.bf16.msra.mxu1 %v2743_v46 }
  0x9e   : > { %2461 = vmatpush3.bf16.msra.mxu0 %v2733_v48  ;;  %v911_v48 = vunpack.c.l.s8.bf16 %v883_v47  ;;  %2566 = vmatprep.subr.bf16.mxu1 %v2744_v50 }
  0x9f   : > { %2462 = vmatprep.subr.bf16.mxu0 %v2738_v49  ;;  %v916_v49 = vunpack.c.h.s8.bf16 %v884_v42 }
  0xa1   : > { %2559 = vmatmul.mubr.bf16.gmra.mxu0 %v2736_v54  ;;  %1166 = vmatmul.mubr.bf16.gmra.mxu1 %v897_v13  ;;  %v2747_v54 = vld [vmem:[#allocation10 + $0x10] sm:$0xff]  }
  0xa2   : > { %2463 = vmatpush3.bf16.msra.mxu0 %v2739_v56  ;;  %1238 = vmatprep.mubr.bf16.mxu0 %v888_v57  ;;  %v2749_v56 = vld [vmem:[#allocation10] sm:$0xff]  }
  0xa3   : > { %2464 = vmatprep.subr.bf16.mxu0 %v2740_v58  ;;  %1173 = vmatprep.mubr.bf16.mxu1 %v902_v17  ;;  %v3265_v57 = vld [vmem:[%s3873_s5] ss:$0 sm:$0xff] }
  0xa4   : > { %2567 = vmatpush3.bf16.msra.mxu1 %v2744_v50 }
  0xa5   : > { %2568 = vmatprep.subr.bf16.mxu1 %v2745_v52 }
  0xa6   : > { %2465 = vmatpush3.bf16.msra.mxu0 %v2741_v60 }
  0xa8   : > { %2569 = vmatpush3.bf16.msra.mxu1 %v2745_v52 }
  0xa9   : > { %1239 = vmatmul.mubr.bf16.vlgmr.msra.gmra.mxu0 %v887_v4  ;;  %1174 = vmatmul.mubr.bf16.gmra.mxu1 %v901_v23 }
  0xaa   : > { %1246 = vmatprep.mubr.bf16.mxu0 %v892_v6  ;;  %1181 = vmatprep.mubr.bf16.mxu1 %v906_v27 }
  0xab   : > { %2570 = vmatprep.subr.bf16.mxu1 %v2746_v53 }
  0xac   : > { %2571 = vmatpush3.bf16.msra.mxu1 %v2746_v53 }
  0xad   : > { %2572 = vmatprep.subr.bf16.mxu1 %v2747_v54 }
  0xb0   : > { %2573 = vmatpush3.bf16.msra.mxu1 %v2747_v54 }
  0xb1   : > { %1247 = vmatmul.mubr.bf16.gmra.mxu0 %v891_v12  ;;  %1182 = vmatmul.mubr.bf16.gmra.mxu1 %v905_v33 }
  0xb2   : > { %1254 = vmatprep.mubr.bf16.mxu0 %v896_v16  ;;  %1189 = vmatprep.mubr.bf16.mxu1 %v910_v35 }
  0xb3   : > { %2574 = vmatprep.subr.bf16.mxu1 %v2748_v55 }
  0xb4   : > { %2575 = vmatpush3.bf16.msra.mxu1 %v2748_v55 }
  0xb5   : > { %2576 = vmatprep.subr.bf16.mxu1 %v2749_v56 }
  0xb8   : > { %2577 = vmatpush3.bf16.msra.mxu1 %v2749_v56 }
  0xb9   : > { %1255 = vmatmul.mubr.bf16.gmra.mxu0 %v895_v22  ;;  %1190 = vmatmul.mubr.bf16.gmra.mxu1 %v909_v39 }
  0xba   : > { %1262 = vmatprep.mubr.bf16.mxu0 %v900_v26  ;;  %1197 = vmatprep.mubr.bf16.mxu1 %v914_v41 }
  0xc1   : > { %1263 = vmatmul.mubr.bf16.gmra.mxu0 %v899_v32  ;;  %1198 = vmatmul.mubr.bf16.gmra.mxu1 %v913_v44 }
  0xc2   : > { %1270 = vmatprep.mubr.bf16.mxu0 %v904_v34 }
  0xc9   : > { %1271 = vmatmul.mubr.bf16.gmra.mxu0 %v903_v38 }
  0xca   : > { %1278 = vmatprep.mubr.bf16.mxu0 %v908_v40 }
  0xd1   : > { %1279 = vmatmul.mubr.bf16.gmra.mxu0 %v907_v43 }
  0xd2   : > { %1286 = vmatprep.mubr.bf16.mxu0 %v912_v45 }
  0xd9   : > { %1287 = vmatmul.mubr.bf16.gmra.mxu0 %v911_v48 }
  0xda   : > { %1294 = vmatprep.mubr.bf16.mxu0 %v916_v49 }
  0xe1   : > { %1295 = vmatmul.mubr.bf16.gmra.mxu0 %v915_v51 }
  0xf3   : > { %v1373_v53 = vpop.permute.xlu0 %1372 }
 0x149   : > { %v2548_v58 = vpop.f32.mrf.mxu0  ;;  %v2402_v17 = vpop.f32.mrf.mxu1 }
 0x14a   : > { %v3268_v59 = vadd.f32 %v2548_v58, %v3265_v57 }
 0x14b   : > { %v689_v60 = vpop.f32.mrf.mxu0  ;;  %v2403_v21 = vpop.f32.mrf.mxu1 }
 0x14c   : > { %v754_v61 = vmax.f32 %v3268_v59, 0.0  ;;  %v3272_v62 = vadd.f32 %v3265_v57, %v689_v60  ;;  %v2404_v58 = vadd.f32 %v2403_v21, %v2402_v17 }
 0x14d   : > { %v2549_v63 = vpop.f32.mrf.mxu0  ;;  %v2405_v24 = vpop.f32.mrf.mxu1 }
 0x14e   : > { %1678 = vadd.xlane.f32.xlu0 %v754_v61  ;;  %v3917_v1 = vmax.f32 %v3272_v62, 0.0  ;;  %v3278_v2 = vadd.f32 %v2549_v63, %v3265_v57 }
 0x14f   : > { %v692_v0 = vpop.f32.mrf.mxu0  ;;  %v2406_v29 = vpop.f32.mrf.mxu1 }
 0x150   : > { %v3281_v3 = vadd.f32 %v3265_v57, %v692_v0  ;;  %v755_v8 = vmax.f32 %v3278_v2, 0.0  ;;  %v2407_v0 = vadd.f32 %v2406_v29, %v2405_v24 }
 0x151   : > { %v2552_v4 = vpop.f32.mrf.mxu0  ;;  %v2408_v33 = vpop.f32.mrf.mxu1 }
 0x152   : > { %v3914_v5 = vmax.f32 %v3281_v3, 0.0  ;;  %v3285_v6 = vadd.f32 %v2552_v4, %v3265_v57  ;;  %1674 = vadd.xlane.f32.xlu0 %v3917_v1 }
 0x153   : > { %v705_v7 = vpop.f32.mrf.mxu0  ;;  %v2409_v37 = vpop.f32.mrf.mxu1 }
 0x154   : > { %1676 = vadd.xlane.f32.xlu1 %v3914_v5  ;;  %v3912_v10 = vmax.f32 %v3285_v6, 0.0  ;;  %v3294_v11 = vadd.f32 %v3265_v57, %v705_v7  ;;  %v2410_v21 = vadd.f32 %v2409_v37, %v2408_v33 }
 0x155   : > { %v2553_v9 = vpop.f32.mrf.mxu0  ;;  %v2411_v40 = vpop.f32.mrf.mxu1 }
 0x156   : > { %v3297_v12 = vadd.f32 %v2553_v9, %v3265_v57  ;;  %1680 = vadd.xlane.f32.xlu0 %v755_v8  ;;  %v3909_v18 = vmax.f32 %v3294_v11, 0.0 }
 0x157   : > { %v708_v13 = vpop.f32.mrf.mxu0  ;;  %v2412_v45 = vpop.f32.mrf.mxu1 }
 0x158   : > { %v3910_v14 = vmax.f32 %v3297_v12, 0.0  ;;  %v3303_v15 = vadd.f32 %v3265_v57, %v708_v13  ;;  %1686 = vadd.xlane.f32.xlu1 %v3912_v10 }
 0x159   : > { %v2556_v16 = vpop.f32.mrf.mxu0  ;;  %v2414_v49 = vpop.f32.mrf.mxu1 }
 0x15a   : > { %v3309_v19 = vadd.f32 %v2556_v16, %v3265_v57  ;;  %1688 = vadd.xlane.f32.xlu0 %v3910_v14  ;;  %v3906_v22 = vmax.f32 %v3303_v15, 0.0  ;;  %v1378_v16 = vpop.permute.xlu0 %1377 }
 0x15b   : > { %v721_v20 = vpop.f32.mrf.mxu0  ;;  %v2415_v52 = vpop.f32.mrf.mxu1 }
 0x15c   : > { %1682 = vadd.xlane.f32.xlu1 %v3909_v18  ;;  %v3904_v25 = vmax.f32 %v3309_v19, 0.0  ;;  %v3318_v26 = vadd.f32 %v3265_v57, %v721_v20 }
 0x15d   : > { %v2557_v23 = vpop.f32.mrf.mxu0 }
 0x15e   : > { %v3321_v27 = vadd.f32 %v2557_v23, %v3265_v57  ;;  %1684 = vadd.xlane.f32.xlu0 %v3906_v22  ;;  %v3898_v34 = vmax.f32 %v3318_v26, 0.0 }
 0x15f   : > { %v724_v28 = vpop.f32.mrf.mxu0 }
 0x160   : > { %v3901_v30 = vmax.f32 %v3321_v27, 0.0  ;;  %v3327_v31 = vadd.f32 %v3265_v57, %v724_v28  ;;  %1694 = vadd.xlane.f32.xlu1 %v3904_v25 }
 0x161   : > { %v2560_v32 = vpop.f32.mrf.mxu0 }
 0x162   : > { %v3333_v35 = vadd.f32 %v2560_v32, %v3265_v57  ;;  %1696 = vadd.xlane.f32.xlu0 %v3901_v30  ;;  %v3895_v38 = vmax.f32 %v3327_v31, 0.0  ;;  %v1383_v32 = vpop.permute.xlu1 %1382 }
 0x163   : > { %v737_v36 = vpop.f32.mrf.mxu0 }
 0x164   : > { %1690 = vadd.xlane.f32.xlu1 %v3898_v34  ;;  %v3892_v41 = vmax.f32 %v3333_v35, 0.0  ;;  %v3342_v42 = vadd.f32 %v3265_v57, %v737_v36 }
 0x165   : > { %v2561_v39 = vpop.f32.mrf.mxu0 }
 0x166   : > { %v3345_v43 = vadd.f32 %v2561_v39, %v3265_v57  ;;  %1692 = vadd.xlane.f32.xlu0 %v3895_v38  ;;  %v3891_v50 = vmax.f32 %v3342_v42, 0.0 }
 0x167   : > { %v740_v44 = vpop.f32.mrf.mxu0 }
 0x168   : > { %v3890_v46 = vmax.f32 %v3345_v43, 0.0  ;;  %v3351_v47 = vadd.f32 %v3265_v57, %v740_v44  ;;  %1702 = vadd.xlane.f32.xlu1 %v3892_v41  ;;  %v2417_v57 = vpop.f32.mrf.mxu1 }
 0x169   : > { %v2466_v48 = vpop.f32.mrf.mxu0 }
 0x16a   : > { %1704 = vadd.xlane.f32.xlu0 %v3890_v46  ;;  %v3889_v54 = vmax.f32 %v3351_v47, 0.0  ;;  %v2418_v63 = vpop.f32.mrf.mxu1 }
 0x16b   : > { %v2467_v51 = vpop.f32.mrf.mxu0 }
 0x16c   : > { %v2468_v55 = vadd.f32 %v2467_v51, %v2466_v48  ;;  %1698 = vadd.xlane.f32.xlu1 %v3891_v50  ;;  %v2420_v13 = vpop.f32.mrf.mxu1  ;;  %v2413_v50 = vadd.f32 %v2412_v45, %v2411_v40 }
 0x16d   : > { %v2469_v56 = vpop.f32.mrf.mxu0 }
 0x16e   : > { %1700 = vadd.xlane.f32.xlu0 %v3889_v54  ;;  %v1241_v4 = vadd.f32 %v2468_v55, %v2404_v58  ;;  %v2421_v28 = vpop.f32.mrf.mxu1  ;;  %v1388_v58 = vpop.permute.xlu1 %1387 }
 0x16f   : > { %v2470_v60 = vpop.f32.mrf.mxu0 }
 0x170   : > { %v2471_v7 = vadd.f32 %v2470_v60, %v2469_v56  ;;  %v1450_v36 = vmul.f32 %v1373_v53, %v1241_v4  ;;  %v2423_v17 = vpop.f32.mrf.mxu1 }
 0x171   : > { %v2472_v9 = vpop.f32.mrf.mxu0 }
 0x172   : > { %v1244_v20 = vadd.f32 %v2471_v7, %v2407_v0  ;;  %v2424_v46 = vpop.f32.mrf.mxu1 }
 0x173   : > { %v2473_v23 = vpop.f32.mrf.mxu0 }
 0x174   : > { %v1451_v39 = vmul.f32 %v1378_v16, %v1244_v20  ;;  %v2474_v44 = vadd.f32 %v2473_v23, %v2472_v9  ;;  %v2426_v56 = vpop.f32.mrf.mxu1  ;;  %v2416_v20 = vadd.f32 %v2415_v52, %v2414_v49  ;;  %v2422_v49 = vadd.f32 %v2421_v28, %v2420_v13 }
 0x175   : > { %v2475_v48 = vpop.f32.mrf.mxu0 }
 0x176   : > { %v1466_v51 = vpack.c.bf16 %v1451_v39, %v1450_v36  ;;  %v1249_v24 = vadd.f32 %v2474_v44, %v2410_v21  ;;  %v2427_v7 = vpop.f32.mrf.mxu1  ;;  %v2419_v36 = vadd.f32 %v2418_v63, %v2417_v57  ;;  %v1393_v44 = vpop.permute.xlu0 %1392  ;;  %v2425_v57 = vadd.f32 %v2424_v46, %v2423_v17 }
 0x177   : > { %v2476_v54 = vpop.f32.mrf.mxu0 }
 0x178   : > { %v2477_v29 = vadd.f32 %v2476_v54, %v2475_v48  ;;  %2578 = vmatprep.mubr.bf16.mxu1 %v1466_v51  ;;  %v1452_v41 = vmul.f32 %v1383_v32, %v1249_v24  ;;  %v2429_v16 = vpop.f32.mrf.mxu1  ;;  %v1398_v48 = vpop.permute.xlu1 %1397 }
 0x179   : > { %v2478_v55 = vpop.f32.mrf.mxu0 }
 0x17a   : > { %v1252_v60 = vadd.f32 %v2477_v29, %v2413_v50  ;;  %v2430_v23 = vpop.f32.mrf.mxu1 }
 0x17b   : > { %v2479_v0 = vpop.f32.mrf.mxu0 }
 0x17c   : > { %v1453_v53 = vmul.f32 %v1388_v58, %v1252_v60  ;;  %v2480_v4 = vadd.f32 %v2479_v0, %v2478_v55  ;;  %v2432_v39 = vpop.f32.mrf.mxu1 }
 0x17d   : > { %v2481_v9 = vpop.f32.mrf.mxu0 }
 0x17e   : > { %v1467_v33 = vpack.c.bf16 %v1453_v53, %v1452_v41  ;;  %v1257_v40 = vadd.f32 %v2480_v4, %v2416_v20  ;;  %v2433_v51 = vpop.f32.mrf.mxu1 }
 0x17f   : > { %v2482_v37 = vpop.f32.mrf.mxu0 }
 0x180   : > { %v2483_v45 = vadd.f32 %v2482_v37, %v2481_v9  ;;  %2579 = vmatmul.mubr.bf16.vlgmr.msra.gmra.mxu1 %v1467_v33  ;;  %v1454_v32 = vmul.f32 %v1393_v44, %v1257_v40  ;;  %v2435_v58 = vpop.f32.mrf.mxu1  ;;  %v1403_v9 = vpop.permute.xlu0 %1402 }
 0x181   : > { %v2484_v54 = vpop.f32.mrf.mxu0  ;;  %v1408_v33 = vpop.permute.xlu1 %1407 }
 0x182   : > { %v1260_v50 = vadd.f32 %v2483_v45, %v2419_v36  ;;  %v2436_v60 = vpop.f32.mrf.mxu1 }
 0x183   : > { %v2485_v21 = vpop.f32.mrf.mxu0 }
 0x184   : > { %v1455_v24 = vmul.f32 %v1398_v48, %v1260_v50  ;;  %v2486_v29 = vadd.f32 %v2485_v21, %v2484_v54  ;;  %v2438_v4 = vpop.f32.mrf.mxu1  ;;  %v2428_v48 = vadd.f32 %v2427_v7, %v2426_v56  ;;  %v2431_v50 = vadd.f32 %v2430_v23, %v2429_v16 }
 0x185   : > { %v2487_v55 = vpop.f32.mrf.mxu0  ;;  %v2437_v7 = vadd.f32 %v2436_v60, %v2435_v58 }
 0x186   : > { %v1468_v41 = vpack.c.bf16 %v1455_v24, %v1454_v32  ;;  %v1265_v63 = vadd.f32 %v2486_v29, %v2422_v49  ;;  %v2439_v44 = vpop.f32.mrf.mxu1  ;;  %v1413_v24 = vpop.permute.xlu0 %1412 }
 0x187   : > { %v2488_v52 = vpop.f32.mrf.mxu0 }
 0x188   : > { %v2489_v0 = vadd.f32 %v2488_v52, %v2487_v55  ;;  %2582 = vmatprep.mubr.bf16.mxu1 %v1468_v41  ;;  %v1456_v36 = vmul.f32 %v1403_v9, %v1265_v63  ;;  %v2441_v32 = vpop.f32.mrf.mxu1  ;;  %v1418_v55 = vpop.permute.xlu1 %1417 }
 0x189   : > { %v2490_v53 = vpop.f32.mrf.mxu0 }
 0x18a   : > { %v1268_v20 = vadd.f32 %v2489_v0, %v2425_v57  ;;  %v2442_v0 = vpop.f32.mrf.mxu1 }
 0x18b   : > { %v2491_v37 = vpop.f32.mrf.mxu0 }
 0x18c   : > { %v1457_v40 = vmul.f32 %v1408_v33, %v1268_v20  ;;  %v2492_v45 = vadd.f32 %v2491_v37, %v2490_v53  ;;  %v2434_v53 = vadd.f32 %v2433_v51, %v2432_v39  ;;  %v2444_v33 = vpop.f32.mrf.mxu1  ;;  %v1423_v37 = vpop.permute.xlu0 %1422  ;;  %v2443_v51 = vadd.f32 %v2442_v0, %v2441_v32 }
 0x18d   : > { %v2493_v54 = vpop.f32.mrf.mxu0 }
 0x18e   : > { %v1469_v13 = vpack.c.bf16 %v1457_v40, %v1456_v36  ;;  %v1273_v21 = vadd.f32 %v2492_v45, %v2428_v48  ;;  %v1428_v40 = vpop.permute.xlu1 %1427 }
 0x18f   : > { %v2494_v28 = vpop.f32.mrf.mxu0 }
 0x190   : > { %v2495_v46 = vadd.f32 %v2494_v28, %v2493_v54  ;;  %2583 = vmatmul.mubr.bf16.gmra.mxu1 %v1469_v13  ;;  %v1458_v41 = vmul.f32 %v1413_v24, %v1273_v21  ;;  %v2440_v21 = vadd.f32 %v2439_v44, %v2438_v4 }
 0x191   : > { %v2496_v17 = vpop.f32.mrf.mxu0 }
 0x192   : > { %v1276_v29 = vadd.f32 %v2495_v46, %v2431_v50  ;;  %v2445_v50 = vpop.f32.mrf.mxu1 }
 0x193   : > { %v2497_v49 = vpop.f32.mrf.mxu0 }
 0x194   : > { %v1459_v52 = vmul.f32 %v1418_v55, %v1276_v29  ;;  %v2498_v57 = vadd.f32 %v2497_v49, %v2496_v17  ;;  %v2447_v60 = vpop.f32.mrf.mxu1  ;;  %v1433_v29 = vpop.permute.xlu0 %1432 }
 0x195   : > { %v2499_v63 = vpop.f32.mrf.mxu0  ;;  %v1438_v49 = vpop.permute.xlu1 %1437 }
 0x196   : > { %v1470_v9 = vpack.c.bf16 %v1459_v52, %v1458_v41  ;;  %v1281_v20 = vadd.f32 %v2498_v57, %v2434_v53  ;;  %v2448_v53 = vpop.f32.mrf.mxu1 }
 0x197   : > { %v2500_v56 = vpop.f32.mrf.mxu0  ;;  %v2449_v44 = vadd.f32 %v2448_v53, %v2447_v60 }
 0x198   : > { %v2501_v16 = vadd.f32 %v2500_v56, %v2499_v63  ;;  %2586 = vmatprep.mubr.bf16.mxu1 %v1470_v9  ;;  %v1460_v54 = vmul.f32 %v1423_v37, %v1281_v20  ;;  %v2446_v56 = vadd.f32 %v2445_v50, %v2444_v33 }
 0x199   : > { %v2502_v23 = vpop.f32.mrf.mxu0 }
 0x19a   : > { %v1284_v36 = vadd.f32 %v2501_v16, %v2437_v7  ;;  %v1443_v16 = vpop.permute.xlu0 %1442 }
 0x19b   : > { %v2503_v45 = vpop.f32.mrf.mxu0 }
 0x19c   : > { %v1461_v48 = vmul.f32 %v1428_v40, %v1284_v36  ;;  %v2504_v13 = vadd.f32 %v2503_v45, %v2502_v23  ;;  %v1448_v23 = vpop.permute.xlu1 %1447  ;;  %v2347_v45 = vld [vmem:[%s3875_s7] ss:$0 sm:$0xff] }
 0x19d   : > { %v2505_v28 = vpop.f32.mrf.mxu0 }
 0x19e   : > { %v1471_v46 = vpack.c.bf16 %v1461_v48, %v1460_v54  ;;  %v1289_v17 = vadd.f32 %v2504_v13, %v2440_v21 }
 0x19f   : > { %v2506_v39 = vpop.f32.mrf.mxu0 }
 0x1a0   : > { %v2507_v58 = vadd.f32 %v2506_v39, %v2505_v28  ;;  %2587 = vmatmul.mubr.bf16.gmra.mxu1 %v1471_v46  ;;  %v1462_v52 = vmul.f32 %v1433_v29, %v1289_v17 }
 0x1a1   : > { %v2508_v24 = vpop.f32.mrf.mxu0 }
 0x1a2   : > { %v1292_v55 = vadd.f32 %v2507_v58, %v2443_v51 }
 0x1a3   : > { %v2509_v41 = vpop.f32.mrf.mxu0 }
 0x1a4   : > { %v1463_v57 = vmul.f32 %v1438_v49, %v1292_v55  ;;  %v2510_v63 = vadd.f32 %v2509_v41, %v2508_v24 }
 0x1a5   : > { %v2511_v9 = vpop.f32.mrf.mxu0 }
 0x1a6   : > { %v1472_v7 = vpack.c.bf16 %v1463_v57, %v1462_v52  ;;  %v1297_v20 = vadd.f32 %v2510_v63, %v2446_v56 }
 0x1a7   : > { %v2512_v4 = vpop.f32.mrf.mxu0 }
 0x1a8   : > { %v2513_v32 = vadd.f32 %v2512_v4, %v2511_v9  ;;  %2590 = vmatprep.mubr.bf16.mxu1 %v1472_v7  ;;  %v1464_v37 = vmul.f32 %v1443_v16, %v1297_v20 }
 0x1aa   : > { %v1300_v0 = vadd.f32 %v2513_v32, %v2449_v44 }
 0x1ac   : > { %v1465_v36 = vmul.f32 %v1448_v23, %v1300_v0 }
 0x1ae   : > { %v1473_v40 = vpack.c.bf16 %v1465_v36, %v1464_v37 }
 0x1b0   : > { %2591 = vmatmul.mubr.bf16.gmra.mxu1 %v1473_v40 }
 0x240   : > { %v2580_v54 = vpop.f32.mrf.mxu1 }
 0x241   : > { %v3366_v48 = vadd.f32 %v2580_v54, %v2347_v45 }
 0x242   : > { %v1579_v33 = vpop.f32.mrf.mxu1 }
 0x243   : > { %v1644_v13 = vmax.f32 %v3366_v48, 0.0  ;;  %v3369_v28 = vadd.f32 %v2347_v45, %v1579_v33 }
 0x244   : > { %v2581_v50 = vpop.f32.mrf.mxu1 }
 0x245   : > { %v3371_v21 = vadd.f32 %v2581_v50, %v2347_v45  ;;  %1710 = vadd.xlane.f32.xlu1 %v1644_v13  ;;  %v3915_v39 = vmax.f32 %v3369_v28, 0.0  ;;  %v3946_v2 = vmax.f32 %v3369_v28, 0.0 }
 0x246   : > { %v1582_v46 = vpop.f32.mrf.mxu1 }
 0x247   : > { %v3916_v51 = vmax.f32 %v3371_v21, 0.0  ;;  %v3377_v17 = vadd.f32 %v2347_v45, %v1582_v46 }
 0x249   : > { %1706 = vadd.xlane.f32.xlu1 %v3915_v39  ;;  %1712 = vadd.xlane.f32.xlu0 %v3916_v51  ;;  %v3913_v58 = vmax.f32 %v3377_v17, 0.0 }
 0x24d   : > { %1708 = vadd.xlane.f32.xlu0 %v3913_v58 }
 0x250   : > { %v2584_v60 = vpop.f32.mrf.mxu1 }
 0x251   : > { %v3386_v24 = vadd.f32 %v2584_v60, %v2347_v45 }
 0x252   : > { %v1595_v29 = vpop.f32.mrf.mxu1 }
 0x253   : > { %v3911_v55 = vmax.f32 %v3386_v24, 0.0  ;;  %v3389_v49 = vadd.f32 %v2347_v45, %v1595_v29 }
 0x254   : > { %v2585_v41 = vpop.f32.mrf.mxu1 }
 0x255   : > { %v3391_v52 = vadd.f32 %v2585_v41, %v2347_v45  ;;  %1718 = vadd.xlane.f32.xlu1 %v3911_v55  ;;  %v3907_v63 = vmax.f32 %v3389_v49, 0.0 }
 0x256   : > { %v1598_v57 = vpop.f32.mrf.mxu1 }
 0x257   : > { %v3908_v53 = vmax.f32 %v3391_v52, 0.0  ;;  %v3397_v9 = vadd.f32 %v2347_v45, %v1598_v57 }
 0x259   : > { %1714 = vadd.xlane.f32.xlu1 %v3907_v63  ;;  %1720 = vadd.xlane.f32.xlu0 %v3908_v53  ;;  %v3905_v56 = vmax.f32 %v3397_v9, 0.0 }
 0x25d   : > { %1716 = vadd.xlane.f32.xlu0 %v3905_v56 }
 0x260   : > { %v2588_v7 = vpop.f32.mrf.mxu1 }
 0x261   : > { %v3406_v4 = vadd.f32 %v2588_v7, %v2347_v45 }
 0x262   : > { %v1611_v44 = vpop.f32.mrf.mxu1 }
 0x263   : > { %v3902_v20 = vmax.f32 %v3406_v4, 0.0  ;;  %v3409_v32 = vadd.f32 %v2347_v45, %v1611_v44 }
 0x264   : > { %v2589_v0 = vpop.f32.mrf.mxu1 }
 0x265   : > { %v3411_v16 = vadd.f32 %v2589_v0, %v2347_v45  ;;  %1726 = vadd.xlane.f32.xlu1 %v3902_v20  ;;  %v3896_v37 = vmax.f32 %v3409_v32, 0.0 }
 0x266   : > { %v1614_v23 = vpop.f32.mrf.mxu1 }
 0x267   : > { %v3897_v36 = vmax.f32 %v3411_v16, 0.0  ;;  %v3417_v40 = vadd.f32 %v2347_v45, %v1614_v23 }
 0x269   : > { %1722 = vadd.xlane.f32.xlu1 %v3896_v37  ;;  %1728 = vadd.xlane.f32.xlu0 %v3897_v36  ;;  %v3894_v54 = vmax.f32 %v3417_v40, 0.0 }
 0x26d   : > { %1724 = vadd.xlane.f32.xlu0 %v3894_v54 }
 0x270   : > { %v2592_v33 = vpop.f32.mrf.mxu1 }
 0x271   : > { %v3428_v29 = vadd.f32 %v2592_v33, %v2347_v45 }
 0x272   : > { %v1627_v50 = vpop.f32.mrf.mxu1 }
 0x273   : > { %v3426_v46 = vadd.f32 %v2347_v45, %v1627_v50  ;;  %v3899_v44 = vmax.f32 %v3428_v29, 0.0  ;;  %v1679_v50 = vpop.xlane.xlu0 %1678 }
 0x274   : > { %v2593_v60 = vpop.f32.mrf.mxu1 }
 0x275   : > { %v3893_v41 = vmax.f32 %v3426_v46, 0.0  ;;  %v3436_v0 = vadd.f32 %v2593_v60, %v2347_v45 }
 0x276   : > { %v1630_v57 = vpop.f32.mrf.mxu1 }
 0x277   : > { %v3431_v7 = vadd.f32 %v2347_v45, %v1630_v57  ;;  %1730 = vadd.xlane.f32.xlu1 %v3893_v41  ;;  %v3903_v33 = vmax.f32 %v3436_v0, 0.0  ;;  %v1675_v57 = vpop.xlane.xlu0 %1674  ;;  %v1677_v41 = vpop.xlane.xlu1 %1676 }
 0x279   : > { %v3900_v23 = vmax.f32 %v3431_v7, 0.0 }
 0x27b   : > { %1734 = vadd.xlane.f32.xlu1 %v3899_v44  ;;  %1732 = vadd.xlane.f32.xlu0 %v3900_v23  ;;  %v1681_v54 = vpop.xlane.xlu0 %1680  ;;  %v1687_v38 = vpop.xlane.xlu1 %1686 }
 0x27f   : > { %1736 = vadd.xlane.f32.xlu0 %v3903_v33  ;;  %v1689_v45 = vpop.xlane.xlu0 %1688  ;;  %v1683_v60 = vpop.xlane.xlu1 %1682 }
 0x283   : > { %v1685_v37 = vpop.xlane.xlu0 %1684  ;;  %v3446_v36 = vpop.xlane.xlu1 %1694 }
 0x287   : > { %v3448_v34 = vpop.xlane.xlu0 %1696  ;;  %v3450_v44 = vpop.xlane.xlu1 %1690 }
 0x28b   : > { %v3452_v23 = vpop.xlane.xlu0 %1692  ;;  %v3454_v30 = vpop.xlane.xlu1 %1702 }
 0x28f   : > { %v3456_v20 = vpop.xlane.xlu0 %1704  ;;  %v3458_v33 = vpop.xlane.xlu1 %1698 }
 0x293   : > { %v3460_v25 = vpop.xlane.xlu0 %1700 }
 0x2ce   : > { %v1711_v56 = vpop.xlane.xlu1 %1710 }
 0x2cf   : > { %v1740_v22 = vadd.f32 %v1711_v56, %v1679_v50 }
 0x2d1   : > { %v1756_v63 = vmul.f32 0.00390625, %v1740_v22 }
 0x2d2   : > { %v1707_v53 = vpop.xlane.xlu1 %1706  ;;  %v1713_v18 = vpop.xlane.xlu0 %1712 }
 0x2d3   : > { %v3464_v14 = vsub.f32 %v754_v61, %v1756_v63  ;;  %v1738_v55 = vadd.f32 %v1707_v53, %v1675_v57  ;;  %v1741_v10 = vadd.f32 %v1713_v18, %v1681_v54  ;;  %v3468_v58 = vsub.f32 %v1644_v13, %v1756_v63 }
 0x2d4   : > { %v3944_v61 = vmax.f32 %v3272_v62, 0.0  ;;  %v3945_v18 = vmax.f32 %v3371_v21, 0.0  ;;  %v3947_v21 = vmax.f32 %v3281_v3, 0.0  ;;  %v3949_v3 = vmax.f32 %v3285_v6, 0.0 }
 0x2d5   : > { %v1754_v5 = vmul.f32 0.00390625, %v1738_v55  ;;  %v1757_v39 = vmul.f32 0.00390625, %v1741_v10  ;;  %v1804_v51 = vmul.f32 %v3464_v14, %v3464_v14  ;;  %v1852_v10 = vmul.f32 %v3468_v58, %v3468_v58 }
 0x2d6   : > { %v1709_v1 = vpop.xlane.xlu0 %1708  ;;  %v3951_v6 = vmax.f32 %v3297_v12, 0.0 }
 0x2d7   : > { %v3474_v22 = vsub.f32 %v755_v8, %v1757_v39  ;;  %1822 = vadd.xlane.f32.xlu1 %v1804_v51  ;;  %v1739_v59 = vadd.f32 %v1709_v1, %v1677_v41  ;;  %v3478_v53 = vsub.f32 %v3944_v61, %v1754_v5  ;;  %v3482_v48 = vsub.f32 %v3945_v18, %v1757_v39 }
 0x2d8   : > { %v3490_v1 = vsub.f32 %v3946_v2, %v1754_v5  ;;  %v3948_v5 = vmax.f32 %v3377_v17, 0.0  ;;  %v3950_v18 = vmax.f32 %v3386_v24, 0.0  ;;  %v3952_v24 = vmax.f32 %v3294_v11, 0.0 }
 0x2d9   : > { %v1805_v13 = vmul.f32 %v3474_v22, %v3474_v22  ;;  %v1755_v55 = vmul.f32 0.00390625, %v1739_v59  ;;  %v1802_v62 = vmul.f32 %v3478_v53, %v3478_v53  ;;  %v1853_v8 = vmul.f32 %v3482_v48, %v3482_v48 }
 0x2da   : > { %v1850_v28 = vmul.f32 %v3490_v1, %v3490_v1 }
 0x2db   : > { %1870 = vadd.xlane.f32.xlu1 %v1852_v10  ;;  %1824 = vadd.xlane.f32.xlu0 %v1805_v13  ;;  %v3498_v39 = vsub.f32 %v3947_v21, %v1755_v55  ;;  %v3504_v54 = vsub.f32 %v3948_v5, %v1755_v55  ;;  %v3955_v5 = vmax.f32 %v3303_v15, 0.0 }
 0x2dd   : > { %v1803_v57 = vmul.f32 %v3498_v39, %v3498_v39 }
 0x2de   : > { %v1719_v51 = vpop.xlane.xlu1 %1718 }
 0x2df   : > { %v1744_v63 = vadd.f32 %v1719_v51, %v1687_v38  ;;  %1818 = vadd.xlane.f32.xlu1 %v1802_v62  ;;  %1872 = vadd.xlane.f32.xlu0 %v1853_v8  ;;  %v1851_v62 = vmul.f32 %v3504_v54, %v3504_v54 }
 0x2e1   : > { %v1760_v56 = vmul.f32 0.00390625, %v1744_v63  ;;  %v3953_v63 = vmax.f32 %v3391_v52, 0.0 }
 0x2e2   : > { %v1715_v41 = vpop.xlane.xlu1 %1714  ;;  %v1721_v50 = vpop.xlane.xlu0 %1720 }
 0x2e3   : > { %v3510_v59 = vsub.f32 %v3949_v3, %v1760_v56  ;;  %v1742_v38 = vadd.f32 %v1715_v41, %v1683_v60  ;;  %v1745_v61 = vadd.f32 %v1721_v50, %v1689_v45  ;;  %1866 = vadd.xlane.f32.xlu1 %v1850_v28  ;;  %1820 = vadd.xlane.f32.xlu0 %v1803_v57 }
 0x2e4   : > { %v3514_v10 = vsub.f32 %v3950_v18, %v1760_v56 }
 0x2e5   : > { %v1758_v17 = vmul.f32 0.00390625, %v1742_v38  ;;  %v1761_v13 = vmul.f32 0.00390625, %v1745_v61  ;;  %v1808_v55 = vmul.f32 %v3510_v59, %v3510_v59  ;;  %v3956_v38 = vmax.f32 %v3397_v9, 0.0 }
 0x2e6   : > { %v1717_v2 = vpop.xlane.xlu0 %1716  ;;  %v1856_v21 = vmul.f32 %v3514_v10, %v3514_v10 }
 0x2e7   : > { %v3522_v8 = vsub.f32 %v3951_v6, %v1761_v13  ;;  %1830 = vadd.xlane.f32.xlu1 %v1808_v55  ;;  %v1743_v45 = vadd.f32 %v1717_v2, %v1685_v37  ;;  %1868 = vadd.xlane.f32.xlu0 %v1851_v62  ;;  %v3526_v60 = vsub.f32 %v3952_v24, %v1758_v17  ;;  %v3954_v37 = vmax.f32 %v3389_v49, 0.0 }
 0x2e8   : > { %v3534_v56 = vsub.f32 %v3953_v63, %v1761_v13  ;;  %v3957_v13 = vmax.f32 %v3309_v19, 0.0  ;;  %v3958_v62 = vmax.f32 %v3406_v4, 0.0  ;;  %v3960_v4 = vmax.f32 %v3318_v26, 0.0 }
 0x2e9   : > { %v1809_v51 = vmul.f32 %v3522_v8, %v3522_v8  ;;  %v1759_v12 = vmul.f32 0.00390625, %v1743_v45  ;;  %v3538_v28 = vsub.f32 %v3954_v37, %v1758_v17  ;;  %v1806_v11 = vmul.f32 %v3526_v60, %v3526_v60 }
 0x2ea   : > { %v1857_v52 = vmul.f32 %v3534_v56, %v3534_v56 }
 0x2eb   : > { %1878 = vadd.xlane.f32.xlu1 %v1856_v21  ;;  %1832 = vadd.xlane.f32.xlu0 %v1809_v51  ;;  %v3544_v41 = vsub.f32 %v3955_v5, %v1759_v12  ;;  %v1854_v49 = vmul.f32 %v3538_v28, %v3538_v28  ;;  %v3553_v61 = vsub.f32 %v3956_v38, %v1759_v12  ;;  %v3959_v51 = vmax.f32 %v3321_v27, 0.0 }
 0x2ed   : > { %v1807_v17 = vmul.f32 %v3544_v41, %v3544_v41  ;;  %v1855_v19 = vmul.f32 %v3553_v61, %v3553_v61 }
 0x2ee   : > { %v1727_v50 = vpop.xlane.xlu1 %1726 }
 0x2ef   : > { %v1748_v57 = vadd.f32 %v1727_v50, %v3446_v36  ;;  %1826 = vadd.xlane.f32.xlu1 %v1806_v11  ;;  %1880 = vadd.xlane.f32.xlu0 %v1857_v52  ;;  %v3961_v11 = vmax.f32 %v3411_v16, 0.0  ;;  %v3963_v52 = vmax.f32 %v3327_v31, 0.0 }
 0x2f1   : > { %v1764_v3 = vmul.f32 0.00390625, %v1748_v57 }
 0x2f2   : > { %v1723_v18 = vpop.xlane.xlu1 %1722  ;;  %v1729_v15 = vpop.xlane.xlu0 %1728 }
 0x2f3   : > { %v3559_v55 = vsub.f32 %v3957_v13, %v1764_v3  ;;  %v1746_v36 = vadd.f32 %v1723_v18, %v3450_v44  ;;  %v1749_v2 = vadd.f32 %v1729_v15, %v3448_v34  ;;  %1874 = vadd.xlane.f32.xlu1 %v1854_v49  ;;  %1828 = vadd.xlane.f32.xlu0 %v1807_v17 }
 0x2f4   : > { %v3565_v9 = vsub.f32 %v3958_v62, %v1764_v3 }
 0x2f5   : > { %v1762_v6 = vmul.f32 0.00390625, %v1746_v36  ;;  %v1765_v45 = vmul.f32 0.00390625, %v1749_v2  ;;  %v1812_v24 = vmul.f32 %v3559_v55, %v3559_v55 }
 0x2f6   : > { %v1725_v21 = vpop.xlane.xlu0 %1724  ;;  %v1860_v12 = vmul.f32 %v3565_v9, %v3565_v9 }
 0x2f7   : > { %v3573_v44 = vsub.f32 %v3959_v51, %v1765_v45  ;;  %1838 = vadd.xlane.f32.xlu1 %v1812_v24  ;;  %v1747_v34 = vadd.f32 %v1725_v21, %v3452_v23  ;;  %1876 = vadd.xlane.f32.xlu0 %v1855_v19  ;;  %v3578_v63 = vsub.f32 %v3960_v4, %v1762_v6  ;;  %v3962_v23 = vmax.f32 %v3409_v32, 0.0 }
 0x2f8   : > { %v3586_v5 = vsub.f32 %v3961_v11, %v1765_v45  ;;  %v3964_v32 = vmax.f32 %v3417_v40, 0.0  ;;  %v3965_v45 = vmax.f32 %v3333_v35, 0.0  ;;  %v3966_v21 = vmax.f32 %v3342_v42, 0.0 }
 0x2f9   : > { %v1813_v37 = vmul.f32 %v3573_v44, %v3573_v44  ;;  %v1763_v27 = vmul.f32 0.00390625, %v1747_v34  ;;  %v3590_v50 = vsub.f32 %v3962_v23, %v1762_v6  ;;  %v1810_v26 = vmul.f32 %v3578_v63, %v3578_v63 }
 0x2fa   : > { %v1861_v3 = vmul.f32 %v3586_v5, %v3586_v5  ;;  %v3968_v35 = vmax.f32 %v3426_v46, 0.0  ;;  %v3969_v42 = vmax.f32 %v3351_v47, 0.0  ;;  %v3971_v23 = vmax.f32 %v3431_v7, 0.0 }
 0x2fb   : > { %1886 = vadd.xlane.f32.xlu1 %v1860_v12  ;;  %1840 = vadd.xlane.f32.xlu0 %v1813_v37  ;;  %v3596_v57 = vsub.f32 %v3963_v52, %v1763_v27  ;;  %v1858_v49 = vmul.f32 %v3590_v50, %v3590_v50  ;;  %v3604_v38 = vsub.f32 %v3964_v32, %v1763_v27 }
 0x2fd   : > { %v1811_v18 = vmul.f32 %v3596_v57, %v3596_v57  ;;  %v1859_v36 = vmul.f32 %v3604_v38, %v3604_v38 }
 0x2ff   : > { %1834 = vadd.xlane.f32.xlu1 %v1810_v26  ;;  %1888 = vadd.xlane.f32.xlu0 %v1861_v3  ;;  %v3972_v3 = vmax.f32 %v3436_v0, 0.0 }
 0x300   : > { %v1731_v16 = vpop.xlane.xlu1 %1730 }
 0x301   : > { %v1750_v31 = vadd.f32 %v1731_v16, %v3458_v33 }
 0x303   : > { %1882 = vadd.xlane.f32.xlu1 %v1858_v49  ;;  %1836 = vadd.xlane.f32.xlu0 %v1811_v18  ;;  %v1766_v2 = vmul.f32 0.00390625, %v1750_v31 }
 0x304   : > { %v1735_v15 = vpop.xlane.xlu1 %1734  ;;  %v1733_v17 = vpop.xlane.xlu0 %1732 }
 0x305   : > { %v1752_v13 = vadd.f32 %v1735_v15, %v3454_v30  ;;  %v1751_v40 = vadd.f32 %v1733_v17, %v3460_v25  ;;  %v3620_v19 = vsub.f32 %v3966_v21, %v1766_v2  ;;  %v3967_v25 = vmax.f32 %v3345_v43, 0.0 }
 0x306   : > { %v3630_v12 = vsub.f32 %v3968_v35, %v1766_v2  ;;  %v3970_v43 = vmax.f32 %v3428_v29, 0.0 }
 0x307   : > { %v1768_v62 = vmul.f32 0.00390625, %v1752_v13  ;;  %1884 = vadd.xlane.f32.xlu0 %v1859_v36  ;;  %v1767_v51 = vmul.f32 0.00390625, %v1751_v40 }
 0x308   : > { %v1737_v6 = vpop.xlane.xlu0 %1736  ;;  %v1862_v46 = vmul.f32 %v3630_v12, %v3630_v12 }
 0x309   : > { %v3615_v24 = vsub.f32 %v3965_v45, %v1768_v62  ;;  %v1753_v33 = vadd.f32 %v1737_v6, %v3456_v20  ;;  %v1814_v20 = vmul.f32 %v3620_v19, %v3620_v19  ;;  %v3636_v37 = vsub.f32 %v3969_v42, %v1767_v51 }
 0x30a   : > { %v3642_v27 = vsub.f32 %v3970_v43, %v1768_v62  ;;  %v3648_v26 = vsub.f32 %v3971_v23, %v1767_v51  ;;  %v3665_v23 = vld [vmem:[%s3876_s8] ss:$0 sm:$0xff] }
 0x30b   : > { %v1816_v30 = vmul.f32 %v3615_v24, %v3615_v24  ;;  %v1769_v34 = vmul.f32 0.00390625, %v1753_v33  ;;  %v1815_v47 = vmul.f32 %v3636_v37, %v3636_v37 }
 0x30c   : > { %v1864_v52 = vmul.f32 %v3642_v27, %v3642_v27  ;;  %v1863_v16 = vmul.f32 %v3648_v26, %v3648_v26 }
 0x30d   : > { %1846 = vadd.xlane.f32.xlu1 %v1816_v30  ;;  %v3626_v4 = vsub.f32 %v3967_v25, %v1769_v34  ;;  %v3656_v29 = vsub.f32 %v3972_v3, %v1769_v34 }
 0x30f   : > { %v1817_v11 = vmul.f32 %v3626_v4, %v3626_v4  ;;  %v1865_v7 = vmul.f32 %v3656_v29, %v3656_v29 }
 0x311   : > { %1842 = vadd.xlane.f32.xlu1 %v1814_v20  ;;  %1848 = vadd.xlane.f32.xlu0 %v1817_v11 }
 0x315   : > { %1890 = vadd.xlane.f32.xlu1 %v1862_v46  ;;  %1844 = vadd.xlane.f32.xlu0 %v1815_v47  ;;  %v3670_v47 = vld [vmem:[%s3876_s8 + $0x1] ss:$0 sm:$0xff] }
 0x319   : > { %1894 = vadd.xlane.f32.xlu1 %v1864_v52  ;;  %1892 = vadd.xlane.f32.xlu0 %v1863_v16 }
 0x31d   : > { %1896 = vadd.xlane.f32.xlu0 %v1865_v7 }
 0x360   : > { %v1823_v49 = vpop.xlane.xlu1 %1822 }
 0x364   : > { %v1871_v32 = vpop.xlane.xlu1 %1870  ;;  %v1825_v18 = vpop.xlane.xlu0 %1824 }
 0x365   : > { %v1900_v31 = vadd.f32 %v1871_v32, %v1823_v49  ;;  %v3678_v32 = vld [vmem:[%s3973_s25] ss:$0 sm:$0xff] }
 0x367   : > { %v1916_v15 = vmul.f32 0.00390625, %v1900_v31 }
 0x368   : > { %v1819_v17 = vpop.xlane.xlu1 %1818  ;;  %v1873_v13 = vpop.xlane.xlu0 %1872 }
 0x369   : > { %v1932_v36 = vadd.f32 1e-05, %v1916_v15  ;;  %v1901_v0 = vadd.f32 %v1873_v13, %v1825_v18  ;;  %v3683_v18 = vld [vmem:[%s3973_s25 + $0x1] ss:$0 sm:$0xff] }
 0x36b   : > { %2750 = vrsqrt.f32 %v1932_v36  ;;  %v1917_v2 = vmul.f32 0.00390625, %v1901_v0 }
 0x36c   : > { %v1867_v62 = vpop.xlane.xlu1 %1866  ;;  %v1821_v45 = vpop.xlane.xlu0 %1820 }
 0x36d   : > { %v1933_v40 = vadd.f32 1e-05, %v1917_v2  ;;  %v1898_v6 = vadd.f32 %v1867_v62, %v1819_v17 }
 0x36f   : > { %2752 = vrsqrt.f32 %v1933_v40  ;;  %v1914_v33 = vmul.f32 0.00390625, %v1898_v6 }
 0x370   : > { %v1831_v21 = vpop.xlane.xlu1 %1830  ;;  %v1869_v51 = vpop.xlane.xlu0 %1868 }
 0x371   : > { %v1930_v30 = vadd.f32 1e-05, %v1914_v33  ;;  %v1899_v34 = vadd.f32 %v1869_v51, %v1821_v45 }
 0x373   : > { %2754 = vrsqrt.f32 %v1930_v30  ;;  %v1915_v25 = vmul.f32 0.00390625, %v1899_v34 }
 0x374   : > { %v1879_v35 = vpop.xlane.xlu1 %1878  ;;  %v1833_v42 = vpop.xlane.xlu0 %1832 }
 0x375   : > { %v1904_v20 = vadd.f32 %v1879_v35, %v1831_v21  ;;  %v1931_v11 = vadd.f32 1e-05, %v1915_v25 }
 0x377   : > { %v1920_v43 = vmul.f32 0.00390625, %v1904_v20  ;;  %2756 = vrsqrt.f32 %v1931_v11 }
 0x378   : > { %v2751_v46 = vpop.eup %2750  ;;  %v1827_v52 = vpop.xlane.xlu1 %1826 }
 0x379   : > { %v1964_v3 = vmul.f32 %v2751_v46, %v3464_v14  ;;  %v2042_v16 = vmul.f32 %v2751_v46, %v3468_v58  ;;  %v1936_v7 = vadd.f32 1e-05, %v1920_v43  ;;  %v1881_v49 = vpop.xlane.xlu0 %1880 }
 0x37a   : > { %v1905_v31 = vadd.f32 %v1881_v49, %v1833_v42 }
 0x37b   : > { %v1987_v15 = vmul.f32 %v3665_v23, %v1964_v3  ;;  %v2065_v17 = vmul.f32 %v3670_v47, %v2042_v16  ;;  %2758 = vrsqrt.f32 %v1936_v7 }
 0x37c   : > { %v2753_v14 = vpop.eup %2752  ;;  %v1921_v58 = vmul.f32 0.00390625, %v1905_v31  ;;  %v1875_v13 = vpop.xlane.xlu1 %1874 }
 0x37d   : > { %v2010_v36 = vadd.f32 %v3678_v32, %v1987_v15  ;;  %v2088_v0 = vadd.f32 %v3683_v18, %v2065_v17  ;;  %v1965_v2 = vmul.f32 %v2753_v14, %v3474_v22  ;;  %v2043_v62 = vmul.f32 %v2753_v14, %v3482_v48  ;;  %v1829_v40 = vpop.xlane.xlu0 %1828 }
 0x37e   : > { %v1937_v6 = vadd.f32 1e-05, %v1921_v58  ;;  %v1902_v45 = vadd.f32 %v1875_v13, %v1827_v52 }
 0x37f   : > { %2026 = vst [vmem:[%s3691_s26 + $0x20] sm:$0xff] %v2010_v36  ;;  %2104 = vst [vmem:[%s3691_s26 + $0x28] sm:$0xff] %v2088_v0  ;;  %v1988_v33 = vmul.f32 %v3665_v23, %v1965_v2  ;;  %v2066_v21 = vmul.f32 %v3670_v47, %v2043_v62 }
 0x380   : > { %v2755_v30 = vpop.eup %2754  ;;  %2760 = vrsqrt.f32 %v1937_v6  ;;  %v1918_v22 = vmul.f32 0.00390625, %v1902_v45  ;;  %v1839_v51 = vpop.xlane.xlu1 %1838 }
 0x381   : > { %v2011_v48 = vadd.f32 %v3678_v32, %v1988_v33  ;;  %v2089_v34 = vadd.f32 %v3683_v18, %v2066_v21  ;;  %v1962_v25 = vmul.f32 %v2755_v30, %v3478_v53  ;;  %v2040_v35 = vmul.f32 %v2755_v30, %v3490_v1  ;;  %v1877_v20 = vpop.xlane.xlu0 %1876 }
 0x382   : > { %v1934_v42 = vadd.f32 1e-05, %v1918_v22  ;;  %v1903_v11 = vadd.f32 %v1877_v20, %v1829_v40 }
 0x383   : > { %2027 = vst [vmem:[%s3691_s26 + $0x30] sm:$0xff] %v2011_v48  ;;  %2105 = vst [vmem:[%s3691_s26 + $0x38] sm:$0xff] %v2089_v34  ;;  %v1985_v43 = vmul.f32 %v3665_v23, %v1962_v25  ;;  %v2063_v46 = vmul.f32 %v3670_v47, %v2040_v35 }
 0x384   : > { %2762 = vrsqrt.f32 %v1934_v42  ;;  %v1919_v52 = vmul.f32 0.00390625, %v1903_v11  ;;  %v1887_v3 = vpop.xlane.xlu1 %1886  ;;  %v2757_v16 = vpop.eup %2756 }
 0x385   : > { %v2008_v7 = vadd.f32 %v3678_v32, %v1985_v43  ;;  %v2086_v53 = vadd.f32 %v3683_v18, %v2063_v46  ;;  %v1908_v1 = vadd.f32 %v1887_v3, %v1839_v51  ;;  %v1841_v49 = vpop.xlane.xlu0 %1840  ;;  %v1963_v31 = vmul.f32 %v2757_v16, %v3498_v39 }
 0x386   : > { %v2041_v15 = vmul.f32 %v2757_v16, %v3504_v54  ;;  %v1935_v17 = vadd.f32 1e-05, %v1919_v52 }
 0x387   : > { %2024 = vst [vmem:[%s3691_s26] sm:$0xff] %v2008_v7  ;;  %2102 = vst [vmem:[%s3691_s26 + $0x8] sm:$0xff] %v2086_v53  ;;  %v1924_v14 = vmul.f32 0.00390625, %v1908_v1  ;;  %v1986_v13 = vmul.f32 %v3665_v23, %v1963_v31 }
 0x388   : > { %v2759_v58 = vpop.eup %2758  ;;  %v2064_v36 = vmul.f32 %v3670_v47, %v2041_v15  ;;  %2764 = vrsqrt.f32 %v1935_v17  ;;  %v1835_v0 = vpop.xlane.xlu1 %1834 }
 0x389   : > { %v1968_v2 = vmul.f32 %v2759_v58, %v3510_v59  ;;  %v2046_v62 = vmul.f32 %v2759_v58, %v3514_v10  ;;  %v1940_v39 = vadd.f32 1e-05, %v1924_v14  ;;  %v1889_v40 = vpop.xlane.xlu0 %1888  ;;  %v2009_v54 = vadd.f32 %v3678_v32, %v1986_v13 }
 0x38a   : > { %v2087_v6 = vadd.f32 %v3683_v18, %v2064_v36  ;;  %v1909_v45 = vadd.f32 %v1889_v40, %v1841_v49 }
 0x38b   : > { %v1991_v33 = vmul.f32 %v3665_v23, %v1968_v2  ;;  %v2069_v21 = vmul.f32 %v3670_v47, %v2046_v62  ;;  %2766 = vrsqrt.f32 %v1940_v39  ;;  %2025 = vst [vmem:[%s3691_s26 + $0x10] sm:$0xff] %v2009_v54 }
 0x38c   : > { %2103 = vst [vmem:[%s3691_s26 + $0x18] sm:$0xff] %v2087_v6  ;;  %v1925_v30 = vmul.f32 0.00390625, %v1909_v45  ;;  %v1883_v59 = vpop.xlane.xlu1 %1882 }
 0x38d   : > { %v2761_v22 = vpop.eup %2760  ;;  %v2014_v10 = vadd.f32 %v3678_v32, %v1991_v33  ;;  %v2092_v51 = vadd.f32 %v3683_v18, %v2069_v21  ;;  %v1906_v48 = vadd.f32 %v1883_v59, %v1835_v0  ;;  %v1837_v34 = vpop.xlane.xlu0 %1836 }
 0x38e   : > { %v1969_v25 = vmul.f32 %v2761_v22, %v3522_v8  ;;  %v2047_v35 = vmul.f32 %v2761_v22, %v3534_v56  ;;  %v1941_v20 = vadd.f32 1e-05, %v1925_v30 }
 0x38f   : > { %2030 = vst [vmem:[%s3691_s26 + $0x60] sm:$0xff] %v2014_v10  ;;  %2108 = vst [vmem:[%s3691_s26 + $0x68] sm:$0xff] %v2092_v51  ;;  %v1922_v42 = vmul.f32 0.00390625, %v1906_v48 }
 0x390   : > { %v1992_v11 = vmul.f32 %v3665_v23, %v1969_v25  ;;  %v2070_v43 = vmul.f32 %v3670_v47, %v2047_v35  ;;  %2768 = vrsqrt.f32 %v1941_v20 }
 0x391   : > { %v2763_v46 = vpop.eup %2762  ;;  %v1938_v52 = vadd.f32 1e-05, %v1922_v42  ;;  %v1885_v3 = vpop.xlane.xlu0 %1884 }
 0x392   : > { %v2015_v16 = vadd.f32 %v3678_v32, %v1992_v11  ;;  %v2093_v8 = vadd.f32 %v3683_v18, %v2070_v43  ;;  %v1966_v56 = vmul.f32 %v2763_v46, %v3526_v60  ;;  %v2044_v7 = vmul.f32 %v2763_v46, %v3538_v28 }
 0x393   : > { %2770 = vrsqrt.f32 %v1938_v52  ;;  %v1907_v53 = vadd.f32 %v1885_v3, %v1837_v34 }
 0x394   : > { %2031 = vst [vmem:[%s3691_s26 + $0x70] sm:$0xff] %v2015_v16  ;;  %2109 = vst [vmem:[%s3691_s26 + $0x78] sm:$0xff] %v2093_v8  ;;  %v1989_v1 = vmul.f32 %v3665_v23, %v1966_v56  ;;  %v2067_v49 = vmul.f32 %v3670_v47, %v2044_v7 }
 0x395   : > { %v2765_v31 = vpop.eup %2764  ;;  %v1923_v15 = vmul.f32 0.00390625, %v1907_v53 }
 0x396   : > { %v2012_v17 = vadd.f32 %v3678_v32, %v1989_v1  ;;  %v2090_v14 = vadd.f32 %v3683_v18, %v2067_v49  ;;  %v1967_v60 = vmul.f32 %v2765_v31, %v3544_v41  ;;  %v2045_v28 = vmul.f32 %v2765_v31, %v3553_v61  ;;  %v1847_v58 = vpop.xlane.xlu1 %1846 }
 0x397   : > { %v1939_v13 = vadd.f32 1e-05, %v1923_v15 }
 0x398   : > { %v2767_v36 = vpop.eup %2766  ;;  %2028 = vst [vmem:[%s3691_s26 + $0x40] sm:$0xff] %v2012_v17  ;;  %2106 = vst [vmem:[%s3691_s26 + $0x48] sm:$0xff] %v2090_v14  ;;  %v1990_v0 = vmul.f32 %v3665_v23, %v1967_v60  ;;  %v2068_v2 = vmul.f32 %v3670_v47, %v2045_v28 }
 0x399   : > { %v1972_v62 = vmul.f32 %v2767_v36, %v3559_v55  ;;  %v2050_v39 = vmul.f32 %v2767_v36, %v3565_v9  ;;  %2772 = vrsqrt.f32 %v1939_v13 }
 0x39a   : > { %v2013_v41 = vadd.f32 %v3678_v32, %v1990_v0  ;;  %v2091_v61 = vadd.f32 %v3683_v18, %v2068_v2  ;;  %v1843_v40 = vpop.xlane.xlu1 %1842  ;;  %v1849_v45 = vpop.xlane.xlu0 %1848 }
 0x39b   : > { %v1995_v54 = vmul.f32 %v3665_v23, %v1972_v62  ;;  %v2073_v6 = vmul.f32 %v3670_v47, %v2050_v39 }
 0x39c   : > { %2029 = vst [vmem:[%s3691_s26 + $0x50] sm:$0xff] %v2013_v41  ;;  %2107 = vst [vmem:[%s3691_s26 + $0x58] sm:$0xff] %v2091_v61 }
 0x39d   : > { %v2769_v33 = vpop.eup %2768  ;;  %v2018_v55 = vadd.f32 %v3678_v32, %v1995_v54  ;;  %v2096_v9 = vadd.f32 %v3683_v18, %v2073_v6 }
 0x39e   : > { %v1973_v21 = vmul.f32 %v2769_v33, %v3573_v44  ;;  %v2051_v30 = vmul.f32 %v2769_v33, %v3586_v5  ;;  %v1891_v59 = vpop.xlane.xlu1 %1890  ;;  %v1845_v10 = vpop.xlane.xlu0 %1844 }
 0x39f   : > { %2034 = vst [vmem:[%s3691_s26 + $0xa0] sm:$0xff] %v2018_v55  ;;  %2112 = vst [vmem:[%s3691_s26 + $0xa8] sm:$0xff] %v2096_v9  ;;  %v1910_v22 = vadd.f32 %v1891_v59, %v1843_v40 }
 0x3a0   : > { %v2771_v51 = vpop.eup %2770  ;;  %v1996_v48 = vmul.f32 %v3665_v23, %v1973_v21  ;;  %v2074_v34 = vmul.f32 %v3670_v47, %v2051_v30 }
 0x3a1   : > { %v1970_v25 = vmul.f32 %v2771_v51, %v3578_v63  ;;  %v2048_v35 = vmul.f32 %v2771_v51, %v3590_v50  ;;  %v1926_v20 = vmul.f32 0.00390625, %v1910_v22 }
 0x3a2   : > { %v2019_v44 = vadd.f32 %v3678_v32, %v1996_v48  ;;  %v2097_v5 = vadd.f32 %v3683_v18, %v2074_v34  ;;  %v1895_v42 = vpop.xlane.xlu1 %1894  ;;  %v1893_v3 = vpop.xlane.xlu0 %1892 }
 0x3a3   : > { %v1993_v11 = vmul.f32 %v3665_v23, %v1970_v25  ;;  %v2071_v43 = vmul.f32 %v3670_v47, %v2048_v35  ;;  %v1942_v46 = vadd.f32 1e-05, %v1926_v20  ;;  %v1912_v52 = vadd.f32 %v1895_v42, %v1847_v58 }
 0x3a4   : > { %2035 = vst [vmem:[%s3691_s26 + $0xb0] sm:$0xff] %v2019_v44  ;;  %2113 = vst [vmem:[%s3691_s26 + $0xb8] sm:$0xff] %v2097_v5  ;;  %v1911_v63 = vadd.f32 %v1893_v3, %v1845_v10 }
 0x3a5   : > { %v2016_v50 = vadd.f32 %v3678_v32, %v1993_v11  ;;  %v2094_v16 = vadd.f32 %v3683_v18, %v2071_v43  ;;  %2774 = vrsqrt.f32 %v1942_v46  ;;  %v1928_v8 = vmul.f32 0.00390625, %v1912_v52 }
 0x3a6   : > { %v2773_v56 = vpop.eup %2772  ;;  %v1927_v7 = vmul.f32 0.00390625, %v1911_v63  ;;  %v1897_v31 = vpop.xlane.xlu0 %1896 }
 0x3a7   : > { %2032 = vst [vmem:[%s3691_s26 + $0x80] sm:$0xff] %v2016_v50  ;;  %2110 = vst [vmem:[%s3691_s26 + $0x88] sm:$0xff] %v2094_v16  ;;  %v1971_v53 = vmul.f32 %v2773_v56, %v3596_v57  ;;  %v2049_v1 = vmul.f32 %v2773_v56, %v3604_v38  ;;  %v1944_v49 = vadd.f32 1e-05, %v1928_v8  ;;  %v1913_v17 = vadd.f32 %v1897_v31, %v1849_v45 }
 0x3a8   : > { %v1943_v15 = vadd.f32 1e-05, %v1927_v7 }
 0x3a9   : > { %v1994_v14 = vmul.f32 %v3665_v23, %v1971_v53  ;;  %v2072_v60 = vmul.f32 %v3670_v47, %v2049_v1  ;;  %2776 = vrsqrt.f32 %v1944_v49  ;;  %v1929_v28 = vmul.f32 0.00390625, %v1913_v17 }
 0x3aa   : > { %2778 = vrsqrt.f32 %v1943_v15 }
 0x3ab   : > { %v2017_v58 = vadd.f32 %v3678_v32, %v1994_v14  ;;  %v2095_v13 = vadd.f32 %v3683_v18, %v2072_v60  ;;  %v1945_v36 = vadd.f32 1e-05, %v1929_v28 }
 0x3ad   : > { %2033 = vst [vmem:[%s3691_s26 + $0x90] sm:$0xff] %v2017_v58  ;;  %2111 = vst [vmem:[%s3691_s26 + $0x98] sm:$0xff] %v2095_v13  ;;  %2780 = vrsqrt.f32 %v1945_v36 }
 0x3b2   : > { %v2775_v57 = vpop.eup %2774 }
 0x3b3   : > { %v1974_v38 = vmul.f32 %v2775_v57, %v3620_v19  ;;  %v2052_v0 = vmul.f32 %v2775_v57, %v3630_v12 }
 0x3b5   : > { %v1997_v2 = vmul.f32 %v3665_v23, %v1974_v38  ;;  %v2075_v62 = vmul.f32 %v3670_v47, %v2052_v0 }
 0x3b6   : > { %v2777_v39 = vpop.eup %2776 }
 0x3b7   : > { %v2779_v41 = vpop.eup %2778  ;;  %v2020_v61 = vadd.f32 %v3678_v32, %v1997_v2  ;;  %v2098_v40 = vadd.f32 %v3683_v18, %v2075_v62  ;;  %v1976_v54 = vmul.f32 %v2777_v39, %v3615_v24  ;;  %v2054_v6 = vmul.f32 %v2777_v39, %v3642_v27 }
 0x3b8   : > { %v1975_v45 = vmul.f32 %v2779_v41, %v3636_v37  ;;  %v2053_v19 = vmul.f32 %v2779_v41, %v3648_v26 }
 0x3b9   : > { %2036 = vst [vmem:[%s3691_s26 + $0xc0] sm:$0xff] %v2020_v61  ;;  %2114 = vst [vmem:[%s3691_s26 + $0xc8] sm:$0xff] %v2098_v40  ;;  %v1999_v12 = vmul.f32 %v3665_v23, %v1976_v54  ;;  %v2077_v33 = vmul.f32 %v3670_v47, %v2054_v6 }
 0x3ba   : > { %v1998_v24 = vmul.f32 %v3665_v23, %v1975_v45  ;;  %v2076_v27 = vmul.f32 %v3670_v47, %v2053_v19  ;;  %v2781_v55 = vpop.eup %2780 }
 0x3bb   : > { %v2022_v37 = vadd.f32 %v3678_v32, %v1999_v12  ;;  %v2100_v9 = vadd.f32 %v3683_v18, %v2077_v33  ;;  %v1977_v30 = vmul.f32 %v2781_v55, %v3626_v4  ;;  %v2055_v59 = vmul.f32 %v2781_v55, %v3656_v29 }
 0x3bc   : > { %v2021_v26 = vadd.f32 %v3678_v32, %v1998_v24  ;;  %v2099_v21 = vadd.f32 %v3683_v18, %v2076_v27 }
 0x3bd   : > { %2038 = vst [vmem:[%s3691_s26 + $0xe0] sm:$0xff] %v2022_v37  ;;  %2116 = vst [vmem:[%s3691_s26 + $0xe8] sm:$0xff] %v2100_v9  ;;  %v2000_v22 = vmul.f32 %v3665_v23, %v1977_v30  ;;  %v2078_v10 = vmul.f32 %v3670_v47, %v2055_v59 }
 0x3be   : > { %2037 = vst [vmem:[%s3691_s26 + $0xd0] sm:$0xff] %v2021_v26  ;;  %2115 = vst [vmem:[%s3691_s26 + $0xd8] sm:$0xff] %v2099_v21 }
 0x3bf   : > { %v2023_v4 = vadd.f32 %v3678_v32, %v2000_v22  ;;  %v2101_v29 = vadd.f32 %v3683_v18, %v2078_v10 }
 0x3c1   : > { %2039 = vst [vmem:[%s3691_s26 + $0xf0] sm:$0xff] %v2023_v4  ;;  %2117 = vst [vmem:[%s3691_s26 + $0xf8] sm:$0xff] %v2101_v29 }
 0x3c2   : > { %2901 = shalt.err (!%p2898_p7)
}
 0x3c3   : > { %s2902_s19 = scalar_lea.hbm %s3814_s29, 4096  ;;  %s2906_s20 = scalar_lea.hbm %s3975_s6, 8192 }
 0x3c4   : > { %p2903_p12 = scmp.ne.s32.totalorder %s3814_s29, %s2902_s19  ;;  %p2907_p5 = scmp.lt.s32.totalorder %s3814_s29, %s3975_s6 }
 0x3c5   : > { %p2908_p6 = scmp.lt.s32.totalorder %s2906_s20, %s2902_s19 }
 0x3c6   : > { %p2904_p2 = pnand %p2903_p12, %p3976_p1 }
 0x3c7   : > { %p2909_p9 = por %p2908_p6, %p2907_p5 }
 0x3c8   : > { %p2905_p0 = pneg %p2904_p2 }
 0x3ca   : > { %p2910_p11 = pnand %p2909_p9, %p2905_p0 }
 0x3cc   : > { %2913 = shalt.err (!%p2910_p11)
}
 0x3cd   : > { %s2990_s1 = smov 256   ;;  %s2991_s4 = smov 16  }
 0x3ce   : > { %2608 = dma.vmem_to_hbm [thread:$0]  (%p3976_p1), %s3816_s28, 4096, %s3814_s29, %s2119_s16, %s2990_s1, %s2990_s1, %s2991_s4  }
 0x3cf PF: > { %s3977_s12 = sld [smem:[#allocation18_spill]]  ;;  %p3980_p3 = scmp.ge.s32.totalorder %s2980_s18, 2 }
 0x3d0   : > { %s3978_s30 = sld [smem:[#allocation20_spill]] }
 0x3d5   : > { %s2148_s9 = sand.u32 1, %s3977_s12  }
 0x3d6   : > { %p3979_p4 = scmp.ne.s32.totalorder %s3978_s30, 0  ;;  %s2149_s10 = scalar_lea.sflag [#allocation6], %s2148_s9 }
 0x3d8   : > { %p2625_p8 = pnand %p3980_p3, %p3979_p4 }
 0x3da   : > { %p2626_p10 = pneg %p2625_p8 }
 0x3dc   : > { %2955 = dma.done.wait (%p2626_p10), %s2149_s10, 4096  }
 0x3dd   : > { %2957 = vsyncadd (%p2626_p10), %s2149_s10, 4294963200  ;;  %s28_s18 = sadd.s32 1, %s2980_s18   ;;  %s3981_s13 = smov %s2964_s14 }
 0x3de   : > { %p25_p13 = scmp.ge.s32.totalorder %s28_s18, 4   ;;  %s3982_s14 = smov %s2968_s15 }
 0x3df   : > { %s3983_s15 = smov %s3176_s21  ;;  %s3984_s16 = smov %s2976_s17 }
 0x3e0   : > { %s3985_s17 = smov %s3987_s27  ;;  %27 = sbr.rel (!%p25_p13) target bundleno = 14 (0xe), region = 133 }
 0x3e5   :  { %2154 = vsyncpa [#allocation5], 1 }
 0x3e6   :  { %2156 = vsyncpa [#allocation5 + $0x1], 1 }
 0x3e7   :  { %2157 = vsyncpa [#allocation8], 1 }
 0x3e8   :  { %2159 = vsyncpa [#allocation8 + $0x1], 1 }
 0x3e9   :  { %2160 = vsyncpa [#allocation11], 1 }
 0x3ea   :  { %2161 = vsyncpa [#allocation6], 1 }
 0x3eb   :  { %2163 = vsyncpa [#allocation6 + $0x1], 1 }

</bundles_post_ra>
